<compile_context>
chip_gen: v6e
topology: v6e:2x2x1
jax: 0.10.0
libtpu: 0.0.40
codegen_flags: <defaults>
</compile_context>

<pallas_src>
import jax
import jax.numpy as jnp
from jax.experimental import pallas as pl
from jax.experimental.pallas import tpu as pltpu

# ---- model dimensions (small, consistent with the module's forward) ----
B = 2            # batch
N_MELS = 16      # mel bins (encoder input channels)
T = 8            # time steps
D_MODEL = 32     # encoder hidden width (encoder.config.d_model)
H1, H2, H3 = 1024, 512, 256   # fixed by the nn.Sequential classifier
NUM_CLASSES = 1  # module default (final layer handled as a lane reduction)


def _round_up(x, m):
    return ((x + m - 1) // m) * m


def _classifier_kernel(x_ref, wenc_ref, w1_ref, w2_ref, w3_ref,
                       consts_ref, out_ref):
    """One batch tile of the full forward pass.

    x      : (2, tile_b, n_mels) f32 -- last mel frame of [detector0, detector1]
    wenc   : (n_mels, d_model)   bf16
    w1     : (2*d_model, 1024)   bf16
    w2     : (1024, 512)         bf16
    w3     : (512, 256)          bf16
    consts : (6, 1024) f32 rows = [benc, b1, b2, b3, b4, w4_row]
    out    : (tile_b, 1)         f32
    """
    d_model = wenc_ref.shape[1]
    h2 = w2_ref.shape[1]
    h3 = w3_ref.shape[1]

    # ---- encoder stand-in: per-detector projection + ReLU -------------------
    # TODO(synk): real encoder is an arbitrary HF transformer (black box).
    benc = consts_ref[0:1, 0:d_model]                      # (1, d_model)
    x0 = x_ref[0].astype(jnp.bfloat16)                     # (tile_b, n_mels)
    x1 = x_ref[1].astype(jnp.bfloat16)
    h0 = jnp.maximum(
        jnp.dot(x0, wenc_ref[...], preferred_element_type=jnp.float32) + benc,
        0.0)                                               # output_h1
    h1 = jnp.maximum(
        jnp.dot(x1, wenc_ref[...], preferred_element_type=jnp.float32) + benc,
        0.0)                                               # output_l1

    # ---- torch.cat((h0, h1), dim=1) @ W1 as a split matmul ------------------
    b1 = consts_ref[1:2, :]
    z = (jnp.dot(h0.astype(jnp.bfloat16), w1_ref[0:d_model, :],
                 preferred_element_type=jnp.float32)
         + jnp.dot(h1.astype(jnp.bfloat16), w1_ref[d_model:2 * d_model, :],
                   preferred_element_type=jnp.float32)
         + b1)
    z = jnp.maximum(z, 0.0)                                # (tile_b, 1024)

    b2 = consts_ref[2:3, 0:h2]
    z = jnp.maximum(
        jnp.dot(z.astype(jnp.bfloat16), w2_ref[...],
                preferred_element_type=jnp.float32) + b2, 0.0)

    b3 = consts_ref[3:4, 0:h3]
    z = jnp.maximum(
        jnp.dot(z.astype(jnp.bfloat16), w3_ref[...],
                preferred_element_type=jnp.float32) + b3, 0.0)

    # ---- final Linear(256 -> 1): VPU multiply + lane reduction --------------
    # (avoids an N=1 MXU pass; num_classes == 1 asserted in prepare_params.)
    w4_row = consts_ref[5:6, 0:h3]                         # (1, h3) f32
    b4 = consts_ref[4:5, 0:1]                              # (1, 1)
    logits = jnp.sum(z * w4_row, axis=-1, keepdims=True) + b4
    out_ref[...] = logits.astype(out_ref.dtype)


def ligo_binary_classifier(mel0, mel1, params, *, tile_b=256):
    """mel0, mel1: (B, n_mels, T) f32.  Returns logits (B, 1) f32."""
    wenc, w1, w2, w3, consts = params
    batch, n_mels, t = mel0.shape
    assert mel1.shape == mel0.shape

    # Last-frame selection + detector stacking in the wrapper (free in XLA):
    # only the last mel frame ever reaches the classifier, so this cuts mel
    # DMA by T and removes the in-kernel lane extract / concat relayouts.
    x = jnp.stack([mel0[:, :, -1], mel1[:, :, -1]], axis=0)   # (2, B, n_mels)

    # tile: multiple of 8 (sublanes), capped at tile_b (256 fills v6e/v7x's
    # 256-wide MXU; 128 is sufficient on v5e).  Small batches get a single
    # tile with at most 7 padded rows instead of padding up to the cap.
    tile = min(tile_b, _round_up(batch, 8))
    b_pad = _round_up(batch, tile)
    if b_pad != batch:
        x = jnp.pad(x, ((0, 0), (0, b_pad - batch), (0, 0)))

    grid = (b_pad // tile,)
    x_spec = pl.BlockSpec((2, tile, n_mels), lambda i: (0, i, 0))

    def resident(arr):
        # whole array, same block every grid step -> DMA'd once and kept
        # VMEM-resident; single-buffered (never revisited with new data).
        nd = arr.ndim
        return pl.BlockSpec(arr.shape, lambda i, _nd=nd: (0,) * _nd,
                            pipeline_mode=pl.Buffered(buffer_count=1))

    out = pl.pallas_call(
        _classifier_kernel,
        out_shape=jax.ShapeDtypeStruct((b_pad, NUM_CLASSES), jnp.float32),
        grid=grid,
        in_specs=[x_spec,
                  resident(wenc), resident(w1), resident(w2), resident(w3),
                  resident(consts)],
        out_specs=pl.BlockSpec((tile, NUM_CLASSES), lambda i: (i, 0)),
        compiler_params=pltpu.CompilerParams(
            dimension_semantics=("parallel",)),
    )(x, wenc, w1, w2, w3, consts)

    return out[:batch] if b_pad != batch else out


def init_params(key):
    """Raw f32 parameters (PyTorch-style Linear init)."""
    ks = jax.random.split(key, 10)

    def lin(kw, kb, fan_in, fan_out):
        scale = 1.0 / jnp.sqrt(jnp.float32(fan_in))
        w = jax.random.uniform(kw, (fan_in, fan_out), jnp.float32, -scale, scale)
        b = jax.random.uniform(kb, (1, fan_out), jnp.float32, -scale, scale)
        return w, b

    wenc, benc = lin(ks[0], ks[1], N_MELS, D_MODEL)
    w1, b1 = lin(ks[2], ks[3], 2 * D_MODEL, H1)
    w2, b2 = lin(ks[4], ks[5], H1, H2)
    w3, b3 = lin(ks[6], ks[7], H2, H3)
    w4, b4 = lin(ks[8], ks[9], H3, NUM_CLASSES)
    return (wenc, benc, w1, b1, w2, b2, w3, b3, w4, b4)


def prepare_params(raw):
    """Cast big weights to bf16; pack biases + final-layer row into one f32
    lane-padded const array (one DMA instead of six tiny ones)."""
    (wenc, benc, w1, b1, w2, b2, w3, b3, w4, b4) = raw
    # The in-kernel lane-reduction final layer hard-assumes a single logit.
    assert w4.shape[1] == 1 and b4.shape[1] == 1, (
        "kernel's final-layer lane reduction only supports num_classes == 1")
    width = w1.shape[1]  # 1024 = widest row

    def row(v):
        v = jnp.reshape(v, (1, -1)).astype(jnp.float32)
        return jnp.pad(v, ((0, 0), (0, width - v.shape[1])))

    consts = jnp.concatenate(
        [row(benc), row(b1), row(b2), row(b3), row(b4), row(w4.T)], axis=0)

    # TODO(synk): w2 (1024x512) dominates weight bytes; optionally quantize it
    # to int8 (v5e/v6e) or fp8 (v7x) with per-column scales if accuracy allows.
    return (wenc.astype(jnp.bfloat16), w1.astype(jnp.bfloat16),
            w2.astype(jnp.bfloat16), w3.astype(jnp.bfloat16), consts)


def _reference(mel0, mel1, params):
    """Pure-JAX reference using the same prepared (bf16-cast) params and the
    same bf16-activation / f32-accumulation dot convention as the kernel."""
    wenc, w1, w2, w3, consts = params
    d_model = wenc.shape[1]
    h2, h3 = w2.shape[1], w3.shape[1]
    benc = consts[0:1, 0:d_model]
    b1 = consts[1:2, :]
    b2 = consts[2:3, 0:h2]
    b3 = consts[3:4, 0:h3]
    b4 = consts[4:5, 0:1]
    w4_row = consts[5:6, 0:h3]

    def bdot(a, b):
        return jnp.dot(a.astype(jnp.bfloat16), b,
                       preferred_element_type=jnp.float32)

    h0 = jax.nn.relu(bdot(mel0[:, :, -1], wenc) + benc)
    h1 = jax.nn.relu(bdot(mel1[:, :, -1], wenc) + benc)
    z = jax.nn.relu(bdot(jnp.concatenate([h0, h1], axis=1), w1) + b1)
    z = jax.nn.relu(bdot(z, w2) + b2)
    z = jax.nn.relu(bdot(z, w3) + b3)
    return z @ w4_row.T + b4


if __name__ == "__main__":
    key = jax.random.PRNGKey(0)
    k0, k1, kp = jax.random.split(key, 3)

    mel_tensor_0 = jax.random.normal(k0, (B, N_MELS, T), jnp.float32)
    mel_tensor_1 = jax.random.normal(k1, (B, N_MELS, T), jnp.float32)
    params = prepare_params(init_params(kp))

    logits = ligo_binary_classifier(mel_tensor_0, mel_tensor_1, params)
    jax.block_until_ready(logits)
    assert logits.shape == (B, NUM_CLASSES), logits.shape

    ref = _reference(mel_tensor_0, mel_tensor_1, params)
    assert jnp.allclose(logits, ref, rtol=1e-3, atol=1e-3), (logits, ref)

    print("KERNEL_OK")
</pallas_src>

<mosaic_0001>
module attributes {stable_mosaic.version = 11 : i64} {
  func.func @_classifier_kernel(%arg0: i32, %arg1: memref<2x8x16xf32, #tpu.memory_space<vmem>>, %arg2: memref<16x32xbf16, #tpu.memory_space<vmem>>, %arg3: memref<64x1024xbf16, #tpu.memory_space<vmem>>, %arg4: memref<1024x512xbf16, #tpu.memory_space<vmem>>, %arg5: memref<512x256xbf16, #tpu.memory_space<vmem>>, %arg6: memref<6x1024xf32, #tpu.memory_space<vmem>>, %arg7: memref<8x1xf32, #tpu.memory_space<vmem>>) attributes {dimension_semantics = [#tpu.dimension_semantics<parallel>], iteration_bounds = array<i64: 1>, scalar_prefetch = 0 : i64, scratch_operands = 0 : i64, tpu.core_type = #tpu.core_type<tc>, window_params = [{transform_indices = @transform_0, window_bounds = array<i64: 2, 8, 16>}, {pipeline_mode = #tpu.pipeline_mode<synchronous>, transform_indices = @transform_1, window_bounds = array<i64: 16, 32>}, {pipeline_mode = #tpu.pipeline_mode<synchronous>, transform_indices = @transform_2, window_bounds = array<i64: 64, 1024>}, {pipeline_mode = #tpu.pipeline_mode<synchronous>, transform_indices = @transform_3, window_bounds = array<i64: 1024, 512>}, {pipeline_mode = #tpu.pipeline_mode<synchronous>, transform_indices = @transform_4, window_bounds = array<i64: 512, 256>}, {pipeline_mode = #tpu.pipeline_mode<synchronous>, transform_indices = @transform_5, window_bounds = array<i64: 6, 1024>}, {transform_indices = @transform_6, window_bounds = array<i64: 8, 1>}]} {
    %c0 = arith.constant 0 : index
    %c0_0 = arith.constant 0 : index
    %0 = vector.load %arg6[%c0, %c0_0] : memref<6x1024xf32, #tpu.memory_space<vmem>>, vector<1x32xf32>
    %c0_1 = arith.constant 0 : index
    %c0_2 = arith.constant 0 : index
    %c0_3 = arith.constant 0 : index
    %1 = vector.load %arg1[%c0_1, %c0_2, %c0_3] : memref<2x8x16xf32, #tpu.memory_space<vmem>>, vector<1x8x16xf32>
    %2 = vector.shape_cast %1 : vector<1x8x16xf32> to vector<8x16xf32>
    %3 = arith.truncf %2 : vector<8x16xf32> to vector<8x16xbf16>
    %c1 = arith.constant 1 : index
    %c0_4 = arith.constant 0 : index
    %c0_5 = arith.constant 0 : index
    %4 = vector.load %arg1[%c1, %c0_4, %c0_5] : memref<2x8x16xf32, #tpu.memory_space<vmem>>, vector<1x8x16xf32>
    %5 = vector.shape_cast %4 : vector<1x8x16xf32> to vector<8x16xf32>
    %6 = arith.truncf %5 : vector<8x16xf32> to vector<8x16xbf16>
    %c0_6 = arith.constant 0 : index
    %c0_7 = arith.constant 0 : index
    %7 = vector.load %arg2[%c0_6, %c0_7] : memref<16x32xbf16, #tpu.memory_space<vmem>>, vector<16x32xbf16>
    %cst = arith.constant dense<0.000000e+00> : vector<8x32xf32>
    %8 = tpu.matmul %3, %7, %cst {dimension_numbers = #tpu.dot_dimension_numbers<[1], [0], [0], [1], [0, 0, 1, 1], [], []>} : vector<8x16xbf16>, vector<16x32xbf16>, vector<8x32xf32> -> vector<8x32xf32>
    %9 = vector.broadcast %0 : vector<1x32xf32> to vector<8x32xf32>
    %10 = arith.addf %8, %9 : vector<8x32xf32>
    %cst_8 = arith.constant 0.000000e+00 : f32
    %11 = vector.broadcast %cst_8 : f32 to vector<8x32xf32>
    %12 = arith.maximumf %10, %11 : vector<8x32xf32>
    %c0_9 = arith.constant 0 : index
    %c0_10 = arith.constant 0 : index
    %13 = vector.load %arg2[%c0_9, %c0_10] : memref<16x32xbf16, #tpu.memory_space<vmem>>, vector<16x32xbf16>
    %cst_11 = arith.constant dense<0.000000e+00> : vector<8x32xf32>
    %14 = tpu.matmul %6, %13, %cst_11 {dimension_numbers = #tpu.dot_dimension_numbers<[1], [0], [0], [1], [0, 0, 1, 1], [], []>} : vector<8x16xbf16>, vector<16x32xbf16>, vector<8x32xf32> -> vector<8x32xf32>
    %15 = vector.broadcast %0 : vector<1x32xf32> to vector<8x32xf32>
    %16 = arith.addf %14, %15 : vector<8x32xf32>
    %cst_12 = arith.constant 0.000000e+00 : f32
    %17 = vector.broadcast %cst_12 : f32 to vector<8x32xf32>
    %18 = arith.maximumf %16, %17 : vector<8x32xf32>
    %c1_13 = arith.constant 1 : index
    %c0_14 = arith.constant 0 : index
    %19 = vector.load %arg6[%c1_13, %c0_14] : memref<6x1024xf32, #tpu.memory_space<vmem>>, vector<1x1024xf32>
    %20 = arith.truncf %12 : vector<8x32xf32> to vector<8x32xbf16>
    %c0_15 = arith.constant 0 : index
    %c0_16 = arith.constant 0 : index
    %21 = vector.load %arg3[%c0_15, %c0_16] : memref<64x1024xbf16, #tpu.memory_space<vmem>>, vector<32x1024xbf16>
    %cst_17 = arith.constant dense<0.000000e+00> : vector<8x1024xf32>
    %22 = tpu.matmul %20, %21, %cst_17 {dimension_numbers = #tpu.dot_dimension_numbers<[1], [0], [0], [1], [0, 0, 1, 1], [], []>} : vector<8x32xbf16>, vector<32x1024xbf16>, vector<8x1024xf32> -> vector<8x1024xf32>
    %23 = arith.truncf %18 : vector<8x32xf32> to vector<8x32xbf16>
    %c32 = arith.constant 32 : index
    %c0_18 = arith.constant 0 : index
    %24 = vector.load %arg3[%c32, %c0_18] : memref<64x1024xbf16, #tpu.memory_space<vmem>>, vector<32x1024xbf16>
    %cst_19 = arith.constant dense<0.000000e+00> : vector<8x1024xf32>
    %25 = tpu.matmul %23, %24, %cst_19 {dimension_numbers = #tpu.dot_dimension_numbers<[1], [0], [0], [1], [0, 0, 1, 1], [], []>} : vector<8x32xbf16>, vector<32x1024xbf16>, vector<8x1024xf32> -> vector<8x1024xf32>
    %26 = arith.addf %22, %25 : vector<8x1024xf32>
    %27 = vector.broadcast %19 : vector<1x1024xf32> to vector<8x1024xf32>
    %28 = arith.addf %26, %27 : vector<8x1024xf32>
    %cst_20 = arith.constant 0.000000e+00 : f32
    %29 = vector.broadcast %cst_20 : f32 to vector<8x1024xf32>
    %30 = arith.maximumf %28, %29 : vector<8x1024xf32>
    %c2 = arith.constant 2 : index
    %c0_21 = arith.constant 0 : index
    %31 = vector.load %arg6[%c2, %c0_21] : memref<6x1024xf32, #tpu.memory_space<vmem>>, vector<1x512xf32>
    %32 = arith.truncf %30 : vector<8x1024xf32> to vector<8x1024xbf16>
    %c0_22 = arith.constant 0 : index
    %c0_23 = arith.constant 0 : index
    %33 = vector.load %arg4[%c0_22, %c0_23] : memref<1024x512xbf16, #tpu.memory_space<vmem>>, vector<1024x512xbf16>
    %cst_24 = arith.constant dense<0.000000e+00> : vector<8x512xf32>
    %34 = tpu.matmul %32, %33, %cst_24 {dimension_numbers = #tpu.dot_dimension_numbers<[1], [0], [0], [1], [0, 0, 1, 1], [], []>} : vector<8x1024xbf16>, vector<1024x512xbf16>, vector<8x512xf32> -> vector<8x512xf32>
    %35 = vector.broadcast %31 : vector<1x512xf32> to vector<8x512xf32>
    %36 = arith.addf %34, %35 : vector<8x512xf32>
    %cst_25 = arith.constant 0.000000e+00 : f32
    %37 = vector.broadcast %cst_25 : f32 to vector<8x512xf32>
    %38 = arith.maximumf %36, %37 : vector<8x512xf32>
    %c3 = arith.constant 3 : index
    %c0_26 = arith.constant 0 : index
    %39 = vector.load %arg6[%c3, %c0_26] : memref<6x1024xf32, #tpu.memory_space<vmem>>, vector<1x256xf32>
    %40 = arith.truncf %38 : vector<8x512xf32> to vector<8x512xbf16>
    %c0_27 = arith.constant 0 : index
    %c0_28 = arith.constant 0 : index
    %41 = vector.load %arg5[%c0_27, %c0_28] : memref<512x256xbf16, #tpu.memory_space<vmem>>, vector<512x256xbf16>
    %cst_29 = arith.constant dense<0.000000e+00> : vector<8x256xf32>
    %42 = tpu.matmul %40, %41, %cst_29 {dimension_numbers = #tpu.dot_dimension_numbers<[1], [0], [0], [1], [0, 0, 1, 1], [], []>} : vector<8x512xbf16>, vector<512x256xbf16>, vector<8x256xf32> -> vector<8x256xf32>
    %43 = vector.broadcast %39 : vector<1x256xf32> to vector<8x256xf32>
    %44 = arith.addf %42, %43 : vector<8x256xf32>
    %cst_30 = arith.constant 0.000000e+00 : f32
    %45 = vector.broadcast %cst_30 : f32 to vector<8x256xf32>
    %46 = arith.maximumf %44, %45 : vector<8x256xf32>
    %c5 = arith.constant 5 : index
    %c0_31 = arith.constant 0 : index
    %47 = vector.load %arg6[%c5, %c0_31] : memref<6x1024xf32, #tpu.memory_space<vmem>>, vector<1x256xf32>
    %c4 = arith.constant 4 : index
    %c0_32 = arith.constant 0 : index
    %48 = vector.load %arg6[%c4, %c0_32] : memref<6x1024xf32, #tpu.memory_space<vmem>>, vector<1x1xf32>
    %49 = vector.broadcast %47 : vector<1x256xf32> to vector<8x256xf32>
    %50 = arith.mulf %46, %49 : vector<8x256xf32>
    %cst_33 = arith.constant dense<0.000000e+00> : vector<8xf32>
    %51 = vector.multi_reduction <add>, %50, %cst_33 [1] : vector<8x256xf32> to vector<8xf32>
    %52 = vector.shape_cast %51 : vector<8xf32> to vector<8x1xf32>
    %53 = vector.broadcast %48 : vector<1x1xf32> to vector<8x1xf32>
    %54 = arith.addf %52, %53 : vector<8x1xf32>
    %c0_34 = arith.constant 0 : index
    %c0_35 = arith.constant 0 : index
    %55 = vector.load %arg7[%c0_34, %c0_35] : memref<8x1xf32, #tpu.memory_space<vmem>>, vector<8x1xf32>
    tpu.vector_store %arg7[%c0_34, %c0_35], %54 {strides = array<i32>} : memref<8x1xf32, #tpu.memory_space<vmem>>, vector<8x1xf32>,
    return
  }
  func.func @transform_0(%arg0: i32) -> (i32, i32, i32) {
    %c0_i32 = arith.constant 0 : i32
    %c0_i32_0 = arith.constant 0 : i32
    %c0_i32_1 = arith.constant 0 : i32
    return %c0_i32, %arg0, %c0_i32_0 : i32, i32, i32
  }
  func.func @transform_1(%arg0: i32) -> (i32, i32) {
    %c0_i32 = arith.constant 0 : i32
    %c0_i32_0 = arith.constant 0 : i32
    %c0_i32_1 = arith.constant 0 : i32
    return %c0_i32, %c0_i32_0 : i32, i32
  }
  func.func @transform_2(%arg0: i32) -> (i32, i32) {
    %c0_i32 = arith.constant 0 : i32
    %c0_i32_0 = arith.constant 0 : i32
    %c0_i32_1 = arith.constant 0 : i32
    return %c0_i32, %c0_i32_0 : i32, i32
  }
  func.func @transform_3(%arg0: i32) -> (i32, i32) {
    %c0_i32 = arith.constant 0 : i32
    %c0_i32_0 = arith.constant 0 : i32
    %c0_i32_1 = arith.constant 0 : i32
    return %c0_i32, %c0_i32_0 : i32, i32
  }
  func.func @transform_4(%arg0: i32) -> (i32, i32) {
    %c0_i32 = arith.constant 0 : i32
    %c0_i32_0 = arith.constant 0 : i32
    %c0_i32_1 = arith.constant 0 : i32
    return %c0_i32, %c0_i32_0 : i32, i32
  }
  func.func @transform_5(%arg0: i32) -> (i32, i32) {
    %c0_i32 = arith.constant 0 : i32
    %c0_i32_0 = arith.constant 0 : i32
    %c0_i32_1 = arith.constant 0 : i32
    return %c0_i32, %c0_i32_0 : i32, i32
  }
  func.func @transform_6(%arg0: i32) -> (i32, i32) {
    %c0_i32 = arith.constant 0 : i32
    %c0_i32_0 = arith.constant 0 : i32
    return %arg0, %c0_i32 : i32, i32
  }
}

</mosaic_0001>

<bundles_post_ra>
// kernel: tpu_custom_call.1
= control target key start
LH: loop header
LB: loop body
LE: loop exit
PB: predicated region body
PF: predicated region fallthrough
CT: control target
= control target key end

     0   :  { %11 = vsyncpa [#allocation3], 0  ;;  %s4397_s0 = inlined_call_operand.hbm [shape: f32[2,8,16], index: 0, kind: input, shape index: {}]   ;;  %s4398_s1 = inlined_call_operand.hbm [shape: bf16[16,32], index: 1, kind: input, shape index: {}]   ;;  %s4399_s2 = inlined_call_operand.hbm [shape: bf16[64,1024], index: 2, kind: input, shape index: {}]   ;;  %s4400_s3 = inlined_call_operand.hbm [shape: bf16[1024,512], index: 3, kind: input, shape index: {}]   ;;  %s4401_s4 = inlined_call_operand.hbm [shape: bf16[512,256], index: 4, kind: input, shape index: {}]   ;;  %s4402_s5 = inlined_call_operand.hbm [shape: f32[6,1024], index: 5, kind: input, shape index: {}]   ;;  %s4403_s6 = inlined_call_operand.vmem [shape: f32[8,1], index: 6, kind: output, shape index: {}]  }
   0x1   :  { %12 = vsyncpa [#allocation5], 0 }
   0x2   :  { %13 = vsyncpa [#allocation8], 0 }
   0x3   :  { %14 = vsyncpa [#allocation11], 0  ;;  %s4216_s21 = smov [#allocation4]  }
   0x4   :  { %s32_s22 = sshll.u32 %s4216_s21, 4  ;;  %s33_s22 = int_to_ptr.vmem [resolvable:$true] %s32_s22 }
   0x5   :  { %s4096_s23 = scalar_lea.vmem %s33_s22, 128  ;;  %p4101_p1 = scmp.lt.s32.totalorder %s33_s22, %s33_s22 }
   0x6   :  { %p4097_p0 = scmp.ne.s32.totalorder %s33_s22, %s4096_s23  ;;  %p4102_p2 = scmp.lt.s32.totalorder %s4096_s23, %s4096_s23 }
   0x8   :  { %p4103_p3 = por %p4102_p2, %p4101_p1 }
   0xa   :  { %p4104_p4 = pnand %p4103_p3, %p4097_p0 }
   0xc   :  { %4107 = shalt.err (!%p4104_p4)
}
   0xd   :  { %s4217_s24 = smov 64   ;;  %s4218_s25 = smov 4  }
   0xe   :  { %38 = dma.hbm_to_vmem [thread:$0]  %s4398_s1, 128, %s33_s22, [#allocation5], %s4217_s24, %s4217_s24, %s4218_s25  }
   0xf   :  { %s4219_s28 = smov [#allocation7]  }
  0x10   :  { %s56_s29 = sshll.u32 %s4219_s28, 4  ;;  %s57_s29 = int_to_ptr.vmem [resolvable:$true] %s56_s29 }
  0x11   :  { %s4116_s30 = scalar_lea.vmem %s57_s29, 32768  ;;  %p4121_p6 = scmp.lt.s32.totalorder %s57_s29, %s57_s29 }
  0x12   :  { %p4117_p5 = scmp.ne.s32.totalorder %s57_s29, %s4116_s30  ;;  %p4122_p7 = scmp.lt.s32.totalorder %s4116_s30, %s4116_s30 }
  0x14   :  { %p4123_p8 = por %p4122_p7, %p4121_p6 }
  0x16   :  { %p4124_p9 = pnand %p4123_p8, %p4117_p5 }
  0x18   :  { %4127 = shalt.err (!%p4124_p9)
}
  0x19   :  { %s4220_s7 = smov 256   ;;  %s4221_s8 = smov 16  }
  0x1a   :  { %62 = dma.hbm_to_vmem [thread:$0]  %s4400_s3, 32768, %s57_s29, [#allocation8], %s4220_s7, %s4220_s7, %s4221_s8  }
  0x1b   :  { %s4222_s11 = smov [#allocation2]  }
  0x1c   :  { %s20_s12 = sshll.u32 %s4222_s11, 4  ;;  %s21_s12 = int_to_ptr.vmem [resolvable:$true] %s20_s12 }
  0x1d   :  { %s4136_s1 = scalar_lea.vmem %s21_s12, 256  ;;  %p4141_p11 = scmp.lt.s32.totalorder %s21_s12, %s21_s12 }
  0x1e   :  { %p4137_p10 = scmp.ne.s32.totalorder %s21_s12, %s4136_s1  ;;  %p4142_p12 = scmp.lt.s32.totalorder %s4136_s1, %s4136_s1 }
  0x20   :  { %p4143_p13 = por %p4142_p12, %p4141_p11 }
  0x22   :  { %p4144_p0 = pnand %p4143_p13, %p4137_p10 }
  0x24   :  { %4147 = shalt.err (!%p4144_p0)
}
  0x25   :  { %s4223_s13 = smov 128   ;;  %s4224_s14 = smov 8  }
  0x26   :  { %26 = dma.hbm_to_vmem [thread:$0]  %s4397_s0, 256, %s21_s12, [#allocation3], %s4223_s13, %s4223_s13, %s4224_s14  }
  0x27   :  { %s4225_s3 = smov [#allocation6]  }
  0x28   :  { %s44_s17 = sshll.u32 %s4225_s3, 4  ;;  %s45_s17 = int_to_ptr.vmem [resolvable:$true] %s44_s17 }
  0x29   :  { %s4156_s18 = scalar_lea.vmem %s45_s17, 4096  ;;  %p4161_p2 = scmp.lt.s32.totalorder %s45_s17, %s45_s17 }
  0x2a   :  { %p4157_p1 = scmp.ne.s32.totalorder %s45_s17, %s4156_s18  ;;  %p4162_p3 = scmp.lt.s32.totalorder %s4156_s18, %s4156_s18 }
  0x2c   :  { %p4163_p4 = por %p4162_p3, %p4161_p2 }
  0x2e   :  { %p4164_p5 = pnand %p4163_p4, %p4157_p1 }
  0x30   :  { %4167 = shalt.err (!%p4164_p5)
}
  0x31   :  { %s4226_s19 = smov 512   ;;  %s4227_s20 = smov 32  }
  0x32   :  { %50 = dma.hbm_to_vmem [thread:$0]  %s4399_s2, 4096, %s45_s17, [#allocation5], %s4226_s19, %s4226_s19, %s4227_s20  }
  0x33   :  { %s4228_s23 = smov [#allocation9]   ;;  %s4229_s25 = smov [#allocation10]  }
  0x34   :  { %s68_s24 = sshll.u32 %s4228_s23, 4  ;;  %s81_s0 = sshll.u32 %s4229_s25, 4  ;;  %s69_s24 = int_to_ptr.vmem [resolvable:$true] %s68_s24  ;;  %s82_s0 = int_to_ptr.vmem [resolvable:$true] %s81_s0 }
  0x35   :  { %s4176_s26 = scalar_lea.vmem %s69_s24, 8192  ;;  %p4181_p7 = scmp.lt.s32.totalorder %s69_s24, %s69_s24 }
  0x36   :  { %p4177_p6 = scmp.ne.s32.totalorder %s69_s24, %s4176_s26  ;;  %p4182_p8 = scmp.lt.s32.totalorder %s4176_s26, %s4176_s26 }
  0x38   :  { %p4183_p9 = por %p4182_p8, %p4181_p7 }
  0x3a   :  { %p4184_p10 = pnand %p4183_p9, %p4177_p6 }
  0x3c   :  { %4187 = shalt.err (!%p4184_p10)
}
  0x3d   :  { %74 = dma.hbm_to_vmem [thread:$0]  %s4401_s4, 8192, %s69_s24, [#allocation8], %s4223_s13, %s4223_s13, %s4224_s14  }
  0x3e   :  { %s4196_s2 = scalar_lea.vmem %s82_s0, 1024  ;;  %p4201_p12 = scmp.lt.s32.totalorder %s82_s0, %s82_s0 }
  0x3f   :  { %p4197_p11 = scmp.ne.s32.totalorder %s82_s0, %s4196_s2  ;;  %p4202_p13 = scmp.lt.s32.totalorder %s4196_s2, %s4196_s2 }
  0x41   :  { %p4203_p0 = por %p4202_p13, %p4201_p12 }
  0x43   :  { %p4204_p1 = pnand %p4203_p0, %p4197_p11 }
  0x45   :  { %4207 = shalt.err (!%p4204_p1)
}
  0x46   :  { %84 = dma.hbm_to_vmem [thread:$0]  %s4402_s5, 1024, %s82_s0, [#allocation11]  }
  0x47   :  { %4208 = dma.done.wait [#allocation3], 256  }
  0x48   :  { %4209 = vsyncadd [#allocation3], 4294967040 }
  0x49   :  { %4210 = dma.done.wait [#allocation5], 4224  }
  0x4a   :  { %4211 = vsyncadd [#allocation5], 4294963072 }
  0x4b   :  { %4212 = dma.done.wait [#allocation8], 40960  }
  0x4c   :  { %4213 = vsyncadd [#allocation8], 4294926336 }
  0x4d   :  { %4214 = dma.done.wait [#allocation11], 1024  }
  0x4e   :  { %4215 = vsyncadd [#allocation11], 4294966272  ;;  %v4230_v0 = vmov 0.0   ;;  %vm4231_vm0 = vmmov 0   ;;  %v3607_v1 = vld [vmem:[#allocation4] sm:$0xff]   ;;  %v108_v2 = vld [vmem:[#allocation2 + $0x8] sm:$0xff] }
  0x4f   :  { %3584 = vmatprep.subr.bf16.mxu1 %v4230_v0  ;;  %3586 = vmatprep.mubr.msk.bf16.mxu1 %vm4231_vm0, %v4230_v0  ;;  %v105_v3 = vld [vmem:[#allocation2] sm:$0xff]  ;;  %v237_v4 = vld [vmem:[#allocation6 + $0xc0] sm:$0xff]  ;;  %v109_v5 = vpack.c.bf16 %v108_v2, %v108_v2  ;;  %vm118_vm1 = vcmask 130048   ;;  %v239_v22 = vld [vmem:[#allocation6 + $0xd0] sm:$0xff]  ;;  %v4232_v27 = vmov 0   ;;  %vm325_vm2 = vcmask 261120  }
  0x50   :  { %3578 = vmatprep.subr.bf16.mxu0 %v4230_v0  ;;  %3580 = vmatprep.mubr.msk.bf16.mxu0 %vm4231_vm0, %v4230_v0  ;;  %v106_v6 = vpack.c.bf16 %v105_v3, %v105_v3  ;;  %v241_v7 = vld [vmem:[#allocation6 + $0xe0] sm:$0xff]  ;;  %v238_v8 = vld [vmem:[#allocation6 + $0xc8] sm:$0xff]  ;;  %v243_v23 = vld [vmem:[#allocation6 + $0xf0] sm:$0xff]  ;;  %vm3201_vm3 = vcmask 7168  }
  0x51   :  { %3585 = vmatpush3.bf16.msra.mxu1 %v3607_v1  ;;  %3579 = vmatpush3.bf16.msra.mxu0 %v3607_v1  ;;  %v242_v9 = vld [vmem:[#allocation6 + $0xe8] sm:$0xff]  ;;  %v3222_v10 = vcombine.low %v237_v4, %v241_v7  ;;  %v3223_v11 = vcombine.high %v237_v4, %v241_v7  ;;  %v229_v14 = vld [vmem:[#allocation6 + $0x80] sm:$0xff]  ;;  %v240_v24 = vld [vmem:[#allocation6 + $0xd8] sm:$0xff]  ;;  %v3227_v25 = vcombine.high %v239_v22, %v243_v23 }
  0x52   :  { %v3224_v12 = vcombine.low %v238_v8, %v242_v9  ;;  %v3225_v13 = vcombine.high %v238_v8, %v242_v9  ;;  %v233_v15 = vld [vmem:[#allocation6 + $0xa0] sm:$0xff]  ;;  %v230_v16 = vld [vmem:[#allocation6 + $0x88] sm:$0xff]  ;;  %v244_v26 = vld [vmem:[#allocation6 + $0xf8] sm:$0xff]  ;;  %v3226_v28 = vcombine.low %v239_v22, %v243_v23 }
  0x53   :  { %341 = vmatprep.subr.bf16.mxu0 %v3223_v11  ;;  %v3215_v17 = vcombine.high %v229_v14, %v233_v15  ;;  %v234_v18 = vld [vmem:[#allocation6 + $0xa8] sm:$0xff]  ;;  %v3214_v19 = vcombine.low %v229_v14, %v233_v15  ;;  %v3228_v29 = vcombine.low %v240_v24, %v244_v26  ;;  %v3229_v30 = vcombine.high %v240_v24, %v244_v26  ;;  %v104_v31 = vld [vmem:[#allocation10] ss:$0 sm:$0xff]  ;;  %v231_v35 = vld [vmem:[#allocation6 + $0x90] sm:$0xff] }
  0x54   :  { %3587 = vmatmul.mubr.msk.bf16.vlgmr.msra.gmra.mxu1 %vm118_vm1, %v109_v5  ;;  %3581 = vmatmul.mubr.msk.bf16.vlgmr.msra.gmra.mxu0 %vm118_vm1, %v106_v6  ;;  %v3216_v20 = vcombine.low %v230_v16, %v234_v18  ;;  %v3217_v21 = vcombine.high %v230_v16, %v234_v18  ;;  %v235_v37 = vld [vmem:[#allocation6 + $0xb0] sm:$0xff]  ;;  %v232_v38 = vld [vmem:[#allocation6 + $0x98] sm:$0xff]  ;;  %v220_v47 = vld [vmem:[#allocation6 + $0x40] sm:$0xff] }
  0x55   :  { %382 = vmatprep.subr.bf16.mxu1 %v3225_v13  ;;  %342 = vmatpush1.bf16.msra.mxu0 %v3222_v10  ;;  %v236_v39 = vld [vmem:[#allocation6 + $0xb8] sm:$0xff]  ;;  %v3219_v45 = vcombine.high %v231_v35, %v235_v37  ;;  %v224_v49 = vld [vmem:[#allocation6 + $0x60] sm:$0xff]  ;;  %v221_v50 = vld [vmem:[#allocation6 + $0x48] sm:$0xff]  ;;  %v3218_v53 = vcombine.low %v231_v35, %v235_v37 }
  0x56   :  { %383 = vmatpush1.bf16.msra.mxu1 %v3224_v12  ;;  %343 = vmatprep.subr.bf16.mxu0 %v3215_v17  ;;  %v3221_v46 = vcombine.high %v232_v38, %v236_v39  ;;  %v225_v51 = vld [vmem:[#allocation6 + $0x68] sm:$0xff]  ;;  %v3220_v54 = vcombine.low %v232_v38, %v236_v39  ;;  %v3243_v55 = vcombine.high %v220_v47, %v224_v49  ;;  %v212_v57 = vld [vmem:[#allocation6] sm:$0xff]  ;;  %v222_v2 = vld [vmem:[#allocation6 + $0x50] sm:$0xff] }
  0x57   :  { %384 = vmatprep.subr.bf16.mxu1 %v3217_v21  ;;  %361 = vmatprep.mubr.bf16.mxu0 %v4232_v27  ;;  %v3245_v56 = vcombine.high %v221_v50, %v225_v51  ;;  %v216_v58 = vld [vmem:[#allocation6 + $0x20] sm:$0xff]  ;;  %v213_v59 = vld [vmem:[#allocation6 + $0x8] sm:$0xff]  ;;  %v3242_v62 = vcombine.low %v220_v47, %v224_v49  ;;  %v3244_v63 = vcombine.low %v221_v50, %v225_v51  ;;  %v226_v3 = vld [vmem:[#allocation6 + $0x70] sm:$0xff] }
  0x58   :  { %402 = vmatprep.mubr.bf16.mxu1 %v4232_v27  ;;  %v217_v60 = vld [vmem:[#allocation6 + $0x28] sm:$0xff]  ;;  %v3235_v0 = vcombine.high %v212_v57, %v216_v58  ;;  %v223_v4 = vld [vmem:[#allocation6 + $0x58] sm:$0xff]  ;;  %v3234_v7 = vcombine.low %v212_v57, %v216_v58  ;;  %v3247_v9 = vcombine.high %v222_v2, %v226_v3  ;;  %v214_v11 = vld [vmem:[#allocation6 + $0x10] sm:$0xff]  ;;  %v3246_v16 = vcombine.low %v222_v2, %v226_v3 }
  0x59   :  { %344 = vmatpush1.bf16.msra.mxu0 %v3214_v19  ;;  %v3237_v1 = vcombine.high %v213_v59, %v217_v60  ;;  %v227_v5 = vld [vmem:[#allocation6 + $0x78] sm:$0xff]  ;;  %v3236_v8 = vcombine.low %v213_v59, %v217_v60  ;;  %v218_v12 = vld [vmem:[#allocation6 + $0x30] sm:$0xff] }
  0x5a   :  { %385 = vmatpush1.bf16.msra.mxu1 %v3216_v20  ;;  %423 = vmatprep.subr.bf16.mxu0 %v3227_v25  ;;  %v3249_v10 = vcombine.high %v223_v4, %v227_v5  ;;  %v215_v13 = vld [vmem:[#allocation6 + $0x18] sm:$0xff]  ;;  %v3248_v17 = vcombine.low %v223_v4, %v227_v5  ;;  %v3239_v18 = vcombine.high %v214_v11, %v218_v12  ;;  %v3610_v22 = vld [vmem:[#allocation7 + $0xe4] ss:$16 sps:$4 sm:$0xff]   ;;  %v3608_v24 = vld [vmem:[#allocation7 + $0xe0] ss:$16 sps:$4 sm:$0xff]  }
  0x5b   :  { %464 = vmatprep.subr.bf16.mxu1 %v3229_v30  ;;  %v219_v14 = vld [vmem:[#allocation6 + $0x38] sm:$0xff]  ;;  %v3238_v20 = vcombine.low %v214_v11, %v218_v12  ;;  %v3613_v23 = vld [vmem:[#allocation7 + $0x2e4] ss:$16 sps:$4 sm:$0xff]   ;;  %v3611_v25 = vld [vmem:[#allocation7 + $0x2e0] ss:$16 sps:$4 sm:$0xff]  }
  0x5c   :  { %v3241_v19 = vcombine.high %v215_v13, %v219_v14  ;;  %v3240_v21 = vcombine.low %v215_v13, %v219_v14  ;;  %v3616_v26 = vld [vmem:[#allocation7 + $0xc4] ss:$16 sps:$4 sm:$0xff]   ;;  %v3617_v30 = vld [vmem:[#allocation7 + $0x2c0] ss:$16 sps:$4 sm:$0xff]   ;;  %v741_v14 = vlaneseq }
  0x5d   :  { %v3631_v35 = vld [vmem:[#allocation7 + $0x284] ss:$16 sps:$4 sm:$0xff]   ;;  %v3629_v37 = vld [vmem:[#allocation7 + $0x280] ss:$16 sps:$4 sm:$0xff]  }
  0x5e   :  { %v3634_v38 = vld [vmem:[#allocation7 + $0x64] ss:$16 sps:$4 sm:$0xff]   ;;  %v3647_v49 = vld [vmem:[#allocation7 + $0x220] ss:$16 sps:$4 sm:$0xff]  }
  0x5f   :  { %v3637_v39 = vld [vmem:[#allocation7 + $0x264] ss:$16 sps:$4 sm:$0xff]   ;;  %v3659_v57 = vld [vmem:[#allocation7 + $0x3e0] ss:$16 sps:$4 sm:$0xff]  }
  0x60   :  { %v3649_v47 = vld [vmem:[#allocation7 + $0x224] ss:$16 sps:$4 sm:$0xff]   ;;  %v3662_v60 = vld [vmem:[#allocation7 + $0x1c0] ss:$16 sps:$4 sm:$0xff]  }
  0x61   :  { %v3652_v50 = vld [vmem:[#allocation7 + $0x4] ss:$16 sps:$4 sm:$0xff]   ;;  %v3674_v4 = vld [vmem:[#allocation7 + $0x180] ss:$16 sps:$4 sm:$0xff]  }
  0x62   :  { %v3655_v51 = vld [vmem:[#allocation7 + $0x204] ss:$16 sps:$4 sm:$0xff]   ;;  %v3677_v5 = vld [vmem:[#allocation7 + $0x380] ss:$16 sps:$4 sm:$0xff]  }
  0x63   :  { %v3664_v58 = vld [vmem:[#allocation7 + $0x1c4] ss:$16 sps:$4 sm:$0xff]   ;;  %v3686_v12 = vld [vmem:[#allocation7 + $0x140] ss:$16 sps:$4 sm:$0xff]  }
  0x64   :  { %v3667_v59 = vld [vmem:[#allocation7 + $0x3c4] ss:$16 sps:$4 sm:$0xff]   ;;  %v3689_v13 = vld [vmem:[#allocation7 + $0x340] ss:$16 sps:$4 sm:$0xff]  }
  0x65   :  { %v3676_v2 = vld [vmem:[#allocation7 + $0x184] ss:$16 sps:$4 sm:$0xff]  }
  0x66   :  { %v3679_v3 = vld [vmem:[#allocation7 + $0x384] ss:$16 sps:$4 sm:$0xff]  }
  0x67   :  { %v3691_v11 = vld [vmem:[#allocation7 + $0x344] ss:$16 sps:$4 sm:$0xff]  }
 0x114   :  { %v200_v32 = vpop.f32.mrf.mxu1  ;;  %v156_v33 = vpop.f32.mrf.mxu0 }
 0x115   :  { %v201_v34 = vadd.f32 %v200_v32, %v104_v31  ;;  %v157_v61 = vadd.f32 %v156_v33, %v104_v31  ;;  %v3622_v31 = vld [vmem:[#allocation7 + $0xa4] ss:$16 sps:$4 sm:$0xff]   ;;  %v3620_v32 = vld [vmem:[#allocation7 + $0xa0] ss:$16 sps:$4 sm:$0xff]  }
 0x116   :  { %v3588_v36 = vpop.f32.mrf.mxu1  ;;  %v3582_v40 = vpop.f32.mrf.mxu0  ;;  %v3623_v33 = vld [vmem:[#allocation7 + $0x2a0] ss:$16 sps:$4 sm:$0xff]  }
 0x117   :  { %v206_v41 = vmax.f32 %v201_v34, 0.0  ;;  %v162_v6 = vmax.f32 %v157_v61, 0.0  ;;  %v3628_v34 = vld [vmem:[#allocation7 + $0x84] ss:$16 sps:$4 sm:$0xff]   ;;  %v3626_v36 = vld [vmem:[#allocation7 + $0x80] ss:$16 sps:$4 sm:$0xff]  }
 0x118   :  { %v203_v42 = vpop.f32.mrf.mxu1  ;;  %v159_v43 = vpop.f32.mrf.mxu0  ;;  %v3632_v40 = vld [vmem:[#allocation7 + $0x60] ss:$16 sps:$4 sm:$0xff]  }
 0x119   :  { %v228_v44 = vpack.c.bf16 %v206_v41, %v206_v41  ;;  %v211_v15 = vpack.c.bf16 %v162_v6, %v162_v6  ;;  %v3635_v41 = vld [vmem:[#allocation7 + $0x260] ss:$16 sps:$4 sm:$0xff]   ;;  %v3640_v42 = vld [vmem:[#allocation7 + $0x44] ss:$16 sps:$4 sm:$0xff]  }
 0x11a   :  { %v3589_v48 = vpop.f32.mrf.mxu1  ;;  %v3583_v52 = vpop.f32.mrf.mxu0  ;;  %v3643_v43 = vld [vmem:[#allocation7 + $0x244] ss:$16 sps:$4 sm:$0xff]   ;;  %v3665_v61 = vld [vmem:[#allocation7 + $0x3c0] ss:$16 sps:$4 sm:$0xff]  }
 0x11b   :  { %3230 = vmatmul.mubr.msk.bf16.vlgmr.msra.gmra.mxu0 %vm325_vm2, %v228_v44  ;;  %3231 = vmatmul.mubr.msk.bf16.vlgmr.msra.gmra.mxu1 %vm325_vm2, %v228_v44  ;;  %v3644_v48 = vld [vmem:[#allocation7 + $0x20] ss:$16 sps:$4 sm:$0xff]   ;;  %v3682_v6 = vld [vmem:[#allocation7 + $0x164] ss:$16 sps:$4 sm:$0xff]  }
 0x11c   :  { %424 = vmatpush1.bf16.msra.mxu0 %v3226_v28  ;;  %465 = vmatpush1.bf16.msra.mxu1 %v3228_v29  ;;  %v3619_v28 = vld [vmem:[#allocation7 + $0x2c4] ss:$16 sps:$4 sm:$0xff]   ;;  %v3614_v29 = vld [vmem:[#allocation7 + $0xc0] ss:$16 sps:$4 sm:$0xff]  }
 0x11d   :  { %425 = vmatprep.subr.bf16.mxu0 %v3219_v45  ;;  %466 = vmatprep.subr.bf16.mxu1 %v3221_v46  ;;  %v3641_v45 = vld [vmem:[#allocation7 + $0x240] ss:$16 sps:$4 sm:$0xff]   ;;  %v3646_v46 = vld [vmem:[#allocation7 + $0x24] ss:$16 sps:$4 sm:$0xff]  }
 0x11e   :  { %443 = vmatprep.mubr.bf16.mxu0 %v4232_v27  ;;  %484 = vmatprep.mubr.bf16.mxu1 %v4232_v27  ;;  %v3650_v52 = vld [vmem:[#allocation7] ss:$16 sps:$4 sm:$0xff]  }
 0x120   :  { %426 = vmatpush1.bf16.msra.mxu0 %v3218_v53  ;;  %467 = vmatpush1.bf16.msra.mxu1 %v3220_v54  ;;  %v3653_v53 = vld [vmem:[#allocation7 + $0x200] ss:$16 sps:$4 sm:$0xff]   ;;  %v3658_v54 = vld [vmem:[#allocation7 + $0x1e4] ss:$16 sps:$4 sm:$0xff]  }
 0x121   :  { %588 = vmatprep.subr.bf16.mxu0 %v3243_v55  ;;  %629 = vmatprep.subr.bf16.mxu1 %v3245_v56  ;;  %v3661_v55 = vld [vmem:[#allocation7 + $0x3e4] ss:$16 sps:$4 sm:$0xff]   ;;  %v3656_v56 = vld [vmem:[#allocation7 + $0x1e0] ss:$16 sps:$4 sm:$0xff]  }
 0x123   :  { %3232 = vmatmul.mubr.msk.bf16.vlgmr.msra.gmra.mxu0 %vm325_vm2, %v228_v44  ;;  %3233 = vmatmul.mubr.msk.bf16.vlgmr.msra.gmra.mxu1 %vm325_vm2, %v228_v44  ;;  %v3638_v44 = vld [vmem:[#allocation7 + $0x40] ss:$16 sps:$4 sm:$0xff]  }
 0x124   :  { %589 = vmatpush1.bf16.msra.mxu0 %v3242_v62  ;;  %630 = vmatpush1.bf16.msra.mxu1 %v3244_v63  ;;  %v3670_v62 = vld [vmem:[#allocation7 + $0x1a4] ss:$16 sps:$4 sm:$0xff]  }
 0x125   :  { %590 = vmatprep.subr.bf16.mxu0 %v3235_v0  ;;  %631 = vmatprep.subr.bf16.mxu1 %v3237_v1  ;;  %v3673_v63 = vld [vmem:[#allocation7 + $0x3a4] ss:$16 sps:$4 sm:$0xff]   ;;  %v3668_v0 = vld [vmem:[#allocation7 + $0x1a0] ss:$16 sps:$4 sm:$0xff]  }
 0x126   :  { %608 = vmatprep.mubr.bf16.mxu0 %v4232_v27  ;;  %649 = vmatprep.mubr.bf16.mxu1 %v4232_v27  ;;  %v3671_v1 = vld [vmem:[#allocation7 + $0x3a0] ss:$16 sps:$4 sm:$0xff]  }
 0x128   :  { %591 = vmatpush1.bf16.msra.mxu0 %v3234_v7  ;;  %632 = vmatpush1.bf16.msra.mxu1 %v3236_v8  ;;  %v3685_v7 = vld [vmem:[#allocation7 + $0x364] ss:$16 sps:$4 sm:$0xff]   ;;  %v3680_v8 = vld [vmem:[#allocation7 + $0x160] ss:$16 sps:$4 sm:$0xff]  }
 0x129   :  { %670 = vmatprep.subr.bf16.mxu0 %v3247_v9  ;;  %711 = vmatprep.subr.bf16.mxu1 %v3249_v10  ;;  %v3683_v9 = vld [vmem:[#allocation7 + $0x360] ss:$16 sps:$4 sm:$0xff]   ;;  %v3688_v10 = vld [vmem:[#allocation7 + $0x144] ss:$16 sps:$4 sm:$0xff]  }
 0x12b   :  { %3250 = vmatmul.mubr.msk.bf16.vlgmr.msra.gmra.mxu0 %vm325_vm2, %v211_v15  ;;  %3251 = vmatmul.mubr.msk.bf16.vlgmr.msra.gmra.mxu1 %vm325_vm2, %v211_v15 }
 0x12c   :  { %671 = vmatpush1.bf16.msra.mxu0 %v3246_v16  ;;  %712 = vmatpush1.bf16.msra.mxu1 %v3248_v17  ;;  %v3697_v16 = vld [vmem:[#allocation7 + $0x324] ss:$16 sps:$4 sm:$0xff]   ;;  %v3692_v17 = vld [vmem:[#allocation7 + $0x120] ss:$16 sps:$4 sm:$0xff]  }
 0x12d   :  { %672 = vmatprep.subr.bf16.mxu0 %v3239_v18  ;;  %713 = vmatprep.subr.bf16.mxu1 %v3241_v19  ;;  %v3695_v18 = vld [vmem:[#allocation7 + $0x320] ss:$16 sps:$4 sm:$0xff]  }
 0x12e   :  { %690 = vmatprep.mubr.bf16.mxu0 %v4232_v27  ;;  %731 = vmatprep.mubr.bf16.mxu1 %v4232_v27  ;;  %v3625_v27 = vld [vmem:[#allocation7 + $0x2a4] ss:$16 sps:$4 sm:$0xff]   ;;  %v208_v19 = vld [vmem:[#allocation10 + $0x1] ss:$8 sm:$0xf] }
 0x130   :  { %673 = vmatpush1.bf16.msra.mxu0 %v3238_v20  ;;  %714 = vmatpush1.bf16.msra.mxu1 %v3240_v21  ;;  %v209_v20 = vld [vmem:[#allocation10 + $0x1] ss:$8 sm:$0xf0]  ;;  %v4308_v21 = vshrl.u32 %v741_v14, 7 }
 0x131   :  { %2364 = vmatprep.subr.bf16.mxu0 %v3610_v22  ;;  %2405 = vmatprep.subr.bf16.mxu1 %v3613_v23  ;;  %v3700_v22 = vld [vmem:[#allocation7 + $0x104] ss:$16 sps:$4 sm:$0xff]  }
 0x132   :  { %v3703_v23 = vld [vmem:[#allocation7 + $0x304] ss:$16 sps:$4 sm:$0xff]  }
 0x133   :  { %3252 = vmatmul.mubr.msk.bf16.vlgmr.msra.gmra.mxu0 %vm325_vm2, %v211_v15  ;;  %3253 = vmatmul.mubr.msk.bf16.vlgmr.msra.gmra.mxu1 %vm325_vm2, %v211_v15  ;;  %v3694_v15 = vld [vmem:[#allocation7 + $0x124] ss:$16 sps:$4 sm:$0xff]  }
 0x134   :  { %2365 = vmatpush1.bf16.msra.mxu0 %v3608_v24  ;;  %2406 = vmatpush1.bf16.msra.mxu1 %v3611_v25  ;;  %v3698_v24 = vld [vmem:[#allocation7 + $0x100] ss:$16 sps:$4 sm:$0xff]  }
 0x135   :  { %2366 = vmatprep.subr.bf16.mxu0 %v3616_v26  ;;  %2407 = vmatprep.subr.bf16.mxu1 %v3619_v28  ;;  %v3701_v25 = vld [vmem:[#allocation7 + $0x300] ss:$16 sps:$4 sm:$0xff]   ;;  %v210_v26 = vor.u32 %v209_v20, %v208_v19  ;;  %v759_v28 = vsub.s32 4, %v4308_v21 }
 0x138   :  { %2367 = vmatpush1.bf16.msra.mxu0 %v3614_v29  ;;  %2408 = vmatpush1.bf16.msra.mxu1 %v3617_v30  ;;  %v767_v29 = vsub.s32 6, %v4308_v21  ;;  %v4312_v30 = vrot.slane %v210_v26, %v759_v28 }
 0x139   :  { %2368 = vmatprep.subr.bf16.mxu0 %v3622_v31  ;;  %2409 = vmatprep.subr.bf16.mxu1 %v3625_v27  ;;  %v3706_v27 = vld [vmem:[#allocation7 + $0x4e4] ss:$16 sps:$4 sm:$0xff]  }
 0x13a   :  { %v4314_v31 = vrot.slane %v210_v26, %v767_v29 }
 0x13c   :  { %2369 = vmatpush1.bf16.msra.mxu0 %v3620_v32  ;;  %2410 = vmatpush1.bf16.msra.mxu1 %v3623_v33  ;;  %v3709_v32 = vld [vmem:[#allocation7 + $0x6e4] ss:$16 sps:$4 sm:$0xff]  }
 0x13d   :  { %2370 = vmatprep.subr.bf16.mxu0 %v3628_v34  ;;  %2411 = vmatprep.subr.bf16.mxu1 %v3631_v35 }
 0x140   :  { %2371 = vmatpush1.bf16.msra.mxu0 %v3626_v36  ;;  %2412 = vmatpush1.bf16.msra.mxu1 %v3629_v37 }
 0x141   :  { %2372 = vmatprep.subr.bf16.mxu0 %v3634_v38  ;;  %2413 = vmatprep.subr.bf16.mxu1 %v3637_v39 }
 0x144   :  { %2373 = vmatpush1.bf16.msra.mxu0 %v3632_v40  ;;  %2414 = vmatpush1.bf16.msra.mxu1 %v3635_v41 }
 0x145   :  { %2374 = vmatprep.subr.bf16.mxu0 %v3640_v42  ;;  %2415 = vmatprep.subr.bf16.mxu1 %v3643_v43 }
 0x148   :  { %2375 = vmatpush1.bf16.msra.mxu0 %v3638_v44  ;;  %2416 = vmatpush1.bf16.msra.mxu1 %v3641_v45  ;;  %v4317_v45 = vsub.s32 0, %v4308_v21 }
 0x149   :  { %2376 = vmatprep.subr.bf16.mxu0 %v3646_v46  ;;  %2417 = vmatprep.subr.bf16.mxu1 %v3649_v47  ;;  %v751_v46 = vsub.s32 2, %v4308_v21 }
 0x14c   :  { %2377 = vmatpush1.bf16.msra.mxu0 %v3644_v48  ;;  %2418 = vmatpush1.bf16.msra.mxu1 %v3647_v49  ;;  %v4321_v49 = vsub.s32 1, %v4308_v21 }
 0x14d   :  { %2378 = vmatprep.subr.bf16.mxu0 %v3652_v50  ;;  %2419 = vmatprep.subr.bf16.mxu1 %v3655_v51  ;;  %v755_v50 = vsub.s32 3, %v4308_v21 }
 0x150   :  { %2379 = vmatpush1.bf16.msra.mxu0 %v3650_v52  ;;  %2420 = vmatpush1.bf16.msra.mxu1 %v3653_v53  ;;  %v744_v53 = vrot.slane %v210_v26, %v4317_v45 }
 0x151   :  { %2380 = vmatprep.subr.bf16.mxu0 %v3658_v54  ;;  %2421 = vmatprep.subr.bf16.mxu1 %v3661_v55  ;;  %v752_v54 = vrot.slane %v210_v26, %v751_v46 }
 0x154   :  { %2381 = vmatpush2.bf16.msra.mxu0 %v3656_v56  ;;  %2422 = vmatpush2.bf16.msra.mxu1 %v3659_v57 }
 0x155   :  { %2382 = vmatprep.subr.bf16.mxu0 %v3664_v58  ;;  %2423 = vmatprep.subr.bf16.mxu1 %v3667_v59  ;;  %v748_v59 = vrot.slane %v210_v26, %v4321_v49 }
 0x158   :  { %2383 = vmatpush2.bf16.msra.mxu0 %v3662_v60  ;;  %2424 = vmatpush2.bf16.msra.mxu1 %v3665_v61  ;;  %v756_v60 = vrot.slane %v210_v26, %v755_v50 }
 0x159   :  { %2384 = vmatprep.subr.bf16.mxu0 %v3670_v62  ;;  %2425 = vmatprep.subr.bf16.mxu1 %v3673_v63 }
 0x15c   :  { %2385 = vmatpush2.bf16.msra.mxu0 %v3668_v0  ;;  %2426 = vmatpush2.bf16.msra.mxu1 %v3671_v1 }
 0x15d   :  { %2386 = vmatprep.subr.bf16.mxu0 %v3676_v2  ;;  %2427 = vmatprep.subr.bf16.mxu1 %v3679_v3 }
 0x160   :  { %2387 = vmatpush2.bf16.msra.mxu0 %v3674_v4  ;;  %2428 = vmatpush2.bf16.msra.mxu1 %v3677_v5  ;;  %v763_v5 = vsub.s32 5, %v4308_v21 }
 0x161   :  { %2388 = vmatprep.subr.bf16.mxu0 %v3682_v6  ;;  %2429 = vmatprep.subr.bf16.mxu1 %v3685_v7  ;;  %v771_v6 = vsub.s32 7, %v4308_v21 }
 0x164   :  { %2389 = vmatpush2.bf16.msra.mxu0 %v3680_v8  ;;  %2430 = vmatpush2.bf16.msra.mxu1 %v3683_v9 }
 0x165   :  { %2390 = vmatprep.subr.bf16.mxu0 %v3688_v10  ;;  %2431 = vmatprep.subr.bf16.mxu1 %v3691_v11 }
 0x168   :  { %2391 = vmatpush2.bf16.msra.mxu0 %v3686_v12  ;;  %2432 = vmatpush2.bf16.msra.mxu1 %v3689_v13 }
 0x169   :  { %2392 = vmatprep.subr.bf16.mxu0 %v3694_v15  ;;  %2433 = vmatprep.subr.bf16.mxu1 %v3697_v16 }
 0x16c   :  { %2393 = vmatpush2.bf16.msra.mxu0 %v3692_v17  ;;  %2434 = vmatpush2.bf16.msra.mxu1 %v3695_v18  ;;  %v764_v17 = vrot.slane %v210_v26, %v763_v5  ;;  %v772_v18 = vrot.slane %v210_v26, %v771_v6  ;;  %v3745_v5 = vld [vmem:[#allocation7 + $0x624] ss:$16 sps:$4 sm:$0xff]   ;;  %v3740_v6 = vld [vmem:[#allocation7 + $0x420] ss:$16 sps:$4 sm:$0xff]  }
 0x16d   :  { %2394 = vmatprep.subr.bf16.mxu0 %v3700_v22  ;;  %2435 = vmatprep.subr.bf16.mxu1 %v3703_v23 }
 0x170   :  { %2395 = vmatpush2.bf16.msra.mxu0 %v3698_v24  ;;  %2436 = vmatpush2.bf16.msra.mxu1 %v3701_v25  ;;  %v3704_v24 = vld [vmem:[#allocation7 + $0x4e0] ss:$16 sps:$4 sm:$0xff]  }
 0x171   :  { %2446 = vmatprep.subr.bf16.mxu0 %v3706_v27  ;;  %2487 = vmatprep.subr.bf16.mxu1 %v3709_v32  ;;  %v3707_v32 = vld [vmem:[#allocation7 + $0x6e0] ss:$16 sps:$4 sm:$0xff]  }
 0x1db   :  { %v363_v33 = vpop.f32.mrf.mxu0  ;;  %v404_v34 = vpop.f32.mrf.mxu1 }
 0x1dd   :  { %v365_v35 = vpop.f32.mrf.mxu0  ;;  %v406_v36 = vpop.f32.mrf.mxu1 }
 0x1df   :  { %v367_v37 = vpop.f32.mrf.mxu0  ;;  %v408_v38 = vpop.f32.mrf.mxu1 }
 0x1e0   :  { %v3715_v37 = vld [vmem:[#allocation7 + $0x6c4] ss:$16 sps:$4 sm:$0xff]  }
 0x1e1   :  { %v368_v39 = vpop.f32.mrf.mxu0  ;;  %v409_v40 = vpop.f32.mrf.mxu1 }
 0x1e3   :  { %v445_v41 = vpop.f32.mrf.mxu0  ;;  %v486_v42 = vpop.f32.mrf.mxu1 }
 0x1e5   :  { %v447_v43 = vpop.f32.mrf.mxu0  ;;  %v488_v44 = vpop.f32.mrf.mxu1 }
 0x1e7   :  { %v449_v47 = vpop.f32.mrf.mxu0  ;;  %v490_v48 = vpop.f32.mrf.mxu1 }
 0x1e9   :  { %v450_v51 = vpop.f32.mrf.mxu0  ;;  %v491_v52 = vpop.f32.mrf.mxu1 }
 0x1ea   :  { %v3721_v51 = vld [vmem:[#allocation7 + $0x6a4] ss:$16 sps:$4 sm:$0xff]  }
 0x1eb   :  { %v610_v55 = vpop.f32.mrf.mxu0  ;;  %v651_v56 = vpop.f32.mrf.mxu1 }
 0x1ec   :  { %v611_v57 = vadd.f32 %v610_v55, %v363_v33  ;;  %v652_v58 = vadd.f32 %v651_v56, %v404_v34  ;;  %v3712_v33 = vld [vmem:[#allocation7 + $0x4c4] ss:$16 sps:$4 sm:$0xff]   ;;  %v3719_v55 = vld [vmem:[#allocation7 + $0x6a0] ss:$16 sps:$4 sm:$0xff]  }
 0x1ed   :  { %v612_v61 = vpop.f32.mrf.mxu0  ;;  %v653_v62 = vpop.f32.mrf.mxu1  ;;  %v3724_v56 = vld [vmem:[#allocation7 + $0x484] ss:$16 sps:$4 sm:$0xff]  }
 0x1ee   :  { %v781_v63 = vadd.f32 %v744_v53, %v611_v57  ;;  %v783_v0 = vadd.f32 %v752_v54, %v652_v58  ;;  %v613_v1 = vadd.f32 %v612_v61, %v365_v35  ;;  %v654_v2 = vadd.f32 %v653_v62, %v406_v36  ;;  %v3716_v54 = vld [vmem:[#allocation7 + $0x4a0] ss:$16 sps:$4 sm:$0xff]   ;;  %v3727_v57 = vld [vmem:[#allocation7 + $0x684] ss:$16 sps:$4 sm:$0xff]  }
 0x1ef   :  { %v614_v3 = vpop.f32.mrf.mxu0  ;;  %v655_v4 = vpop.f32.mrf.mxu1  ;;  %v3722_v58 = vld [vmem:[#allocation7 + $0x480] ss:$16 sps:$4 sm:$0xff]   ;;  %v3733_v61 = vld [vmem:[#allocation7 + $0x664] ss:$16 sps:$4 sm:$0xff]  }
 0x1f0   :  { %v782_v7 = vadd.f32 %v748_v59, %v613_v1  ;;  %v784_v8 = vadd.f32 %v756_v60, %v654_v2  ;;  %v789_v9 = vmax.f32 %v781_v63, 0.0  ;;  %v791_v10 = vmax.f32 %v783_v0, 0.0  ;;  %v3725_v59 = vld [vmem:[#allocation7 + $0x680] ss:$16 sps:$4 sm:$0xff]   ;;  %v3730_v60 = vld [vmem:[#allocation7 + $0x464] ss:$16 sps:$4 sm:$0xff]  }
 0x1f1   :  { %v615_v11 = vpop.f32.mrf.mxu0  ;;  %v656_v12 = vpop.f32.mrf.mxu1  ;;  %v3728_v62 = vld [vmem:[#allocation7 + $0x460] ss:$16 sps:$4 sm:$0xff]   ;;  %v3736_v0 = vld [vmem:[#allocation7 + $0x444] ss:$16 sps:$4 sm:$0xff]  }
 0x1f2   :  { %v790_v13 = vmax.f32 %v782_v7, 0.0  ;;  %v792_v14 = vmax.f32 %v784_v8, 0.0  ;;  %v4336_v25 = vpack.c.bf16 %v789_v9, %v789_v9  ;;  %v4338_v28 = vpack.c.bf16 %v791_v10, %v791_v10  ;;  %v3731_v63 = vld [vmem:[#allocation7 + $0x660] ss:$16 sps:$4 sm:$0xff]   ;;  %v3739_v1 = vld [vmem:[#allocation7 + $0x644] ss:$16 sps:$4 sm:$0xff]  }
 0x1f3   :  { %v692_v15 = vpop.f32.mrf.mxu0  ;;  %v733_v16 = vpop.f32.mrf.mxu1  ;;  %v3734_v2 = vld [vmem:[#allocation7 + $0x440] ss:$16 sps:$4 sm:$0xff]   ;;  %v3742_v4 = vld [vmem:[#allocation7 + $0x424] ss:$16 sps:$4 sm:$0xff]  }
 0x1f4   :  { %v4332_v19 = vpack.c.bf16 %v790_v13, %v790_v13  ;;  %v4334_v20 = vpack.c.bf16 %v792_v14, %v792_v14  ;;  %v693_v22 = vadd.f32 %v692_v15, %v445_v41  ;;  %v734_v23 = vadd.f32 %v733_v16, %v486_v42  ;;  %v3737_v3 = vld [vmem:[#allocation7 + $0x640] ss:$16 sps:$4 sm:$0xff]   ;;  %v3748_v8 = vld [vmem:[#allocation7 + $0x404] ss:$16 sps:$4 sm:$0xff]  }
 0x1f5   :  { %v694_v29 = vpop.f32.mrf.mxu0  ;;  %v735_v27 = vpop.f32.mrf.mxu1  ;;  %v3743_v7 = vld [vmem:[#allocation7 + $0x620] ss:$16 sps:$4 sm:$0xff]   ;;  %v3751_v9 = vld [vmem:[#allocation7 + $0x604] ss:$16 sps:$4 sm:$0xff]  }
 0x1f6   :  { %v4341_v34 = vadd.f32 %v4312_v30, %v693_v22  ;;  %v4344_v26 = vadd.f32 %v4314_v31, %v734_v23  ;;  %v695_v35 = vadd.f32 %v694_v29, %v447_v43  ;;  %v736_v36 = vadd.f32 %v735_v27, %v488_v44  ;;  %2396 = vmatprep.mubr.bf16.mxu0 %v4332_v19  ;;  %v3710_v30 = vld [vmem:[#allocation7 + $0x4c0] ss:$16 sps:$4 sm:$0xff]   ;;  %v3718_v44 = vld [vmem:[#allocation7 + $0x4a4] ss:$16 sps:$4 sm:$0xff]  }
 0x1f7   :  { %2437 = vmatprep.mubr.bf16.mxu1 %v4334_v20  ;;  %v696_v38 = vpop.f32.mrf.mxu0  ;;  %v737_v39 = vpop.f32.mrf.mxu1  ;;  %2397 = vmatmul.mubr.bf16.vlgmr.msra.gmra.mxu0 %v4336_v25  ;;  %v3713_v43 = vld [vmem:[#allocation7 + $0x6c0] ss:$16 sps:$4 sm:$0xff]   ;;  %v3754_v12 = vld [vmem:[#allocation7 + $0x5e4] ss:$16 sps:$4 sm:$0xff]  }
 0x1f8   :  { %v786_v40 = vadd.f32 %v764_v17, %v695_v35  ;;  %v788_v41 = vadd.f32 %v772_v18, %v736_v36  ;;  %2438 = vmatmul.mubr.bf16.vlgmr.msra.gmra.mxu1 %v4338_v28  ;;  %2447 = vmatpush1.bf16.msra.mxu0 %v3704_v24  ;;  %v3746_v10 = vld [vmem:[#allocation7 + $0x400] ss:$16 sps:$4 sm:$0xff]   ;;  %v3757_v13 = vld [vmem:[#allocation7 + $0x7e4] ss:$16 sps:$4 sm:$0xff]  }
 0x1f9   :  { %2488 = vmatpush1.bf16.msra.mxu1 %v3707_v32  ;;  %v697_v31 = vpop.f32.mrf.mxu0  ;;  %v738_v42 = vpop.f32.mrf.mxu1  ;;  %2448 = vmatprep.subr.bf16.mxu0 %v3712_v33  ;;  %v3749_v11 = vld [vmem:[#allocation7 + $0x600] ss:$16 sps:$4 sm:$0xff]   ;;  %v3760_v16 = vld [vmem:[#allocation7 + $0x5c4] ss:$16 sps:$4 sm:$0xff]  }
 0x1fa   :  { %v794_v47 = vmax.f32 %v786_v40, 0.0  ;;  %v796_v48 = vmax.f32 %v788_v41, 0.0  ;;  %2489 = vmatprep.subr.bf16.mxu1 %v3715_v37  ;;  %v3752_v14 = vld [vmem:[#allocation7 + $0x5e0] ss:$16 sps:$4 sm:$0xff]   ;;  %v3763_v17 = vld [vmem:[#allocation7 + $0x7c4] ss:$16 sps:$4 sm:$0xff]  }
 0x1fb   :  { %v3755_v15 = vld [vmem:[#allocation7 + $0x7e0] ss:$16 sps:$4 sm:$0xff]   ;;  %v3766_v23 = vld [vmem:[#allocation7 + $0x5a4] ss:$16 sps:$4 sm:$0xff]  }
 0x1fc   :  { %v4350_v52 = vpack.c.bf16 %v794_v47, %v794_v47  ;;  %v4352_v53 = vpack.c.bf16 %v796_v48, %v796_v48  ;;  %2449 = vmatpush1.bf16.msra.mxu0 %v3710_v30  ;;  %v3758_v18 = vld [vmem:[#allocation7 + $0x5c0] ss:$16 sps:$4 sm:$0xff]   ;;  %v3769_v24 = vld [vmem:[#allocation7 + $0x7a4] ss:$16 sps:$4 sm:$0xff]  }
 0x1fd   :  { %2490 = vmatpush1.bf16.msra.mxu1 %v3713_v43  ;;  %2450 = vmatprep.subr.bf16.mxu0 %v3718_v44  ;;  %v3761_v22 = vld [vmem:[#allocation7 + $0x7c0] ss:$16 sps:$4 sm:$0xff]   ;;  %v3772_v32 = vld [vmem:[#allocation7 + $0x584] ss:$16 sps:$4 sm:$0xff]  }
 0x1fe   :  { %2478 = vmatprep.mubr.bf16.mxu0 %v4350_v52  ;;  %2491 = vmatprep.subr.bf16.mxu1 %v3721_v51  ;;  %v3764_v29 = vld [vmem:[#allocation7 + $0x5a0] ss:$16 sps:$4 sm:$0xff]   ;;  %v3775_v33 = vld [vmem:[#allocation7 + $0x784] ss:$16 sps:$4 sm:$0xff]  }
 0x1ff   :  { %2519 = vmatprep.mubr.bf16.mxu1 %v4352_v53  ;;  %v3767_v27 = vld [vmem:[#allocation7 + $0x7a0] ss:$16 sps:$4 sm:$0xff]   ;;  %v3778_v37 = vld [vmem:[#allocation7 + $0x564] ss:$16 sps:$4 sm:$0xff]  }
 0x200   :  { %2451 = vmatpush1.bf16.msra.mxu0 %v3716_v54  ;;  %v3770_v35 = vld [vmem:[#allocation7 + $0x580] ss:$16 sps:$4 sm:$0xff]   ;;  %v3781_v38 = vld [vmem:[#allocation7 + $0x764] ss:$16 sps:$4 sm:$0xff]  }
 0x201   :  { %2492 = vmatpush1.bf16.msra.mxu1 %v3719_v55  ;;  %2452 = vmatprep.subr.bf16.mxu0 %v3724_v56  ;;  %v3773_v36 = vld [vmem:[#allocation7 + $0x780] ss:$16 sps:$4 sm:$0xff]   ;;  %v3784_v41 = vld [vmem:[#allocation7 + $0x544] ss:$16 sps:$4 sm:$0xff]   ;;  %v793_v56 = vmax.f32 %v4341_v34, 0.0 }
 0x202   :  { %2493 = vmatprep.subr.bf16.mxu1 %v3727_v57  ;;  %v3776_v39 = vld [vmem:[#allocation7 + $0x560] ss:$16 sps:$4 sm:$0xff]   ;;  %v3787_v30 = vld [vmem:[#allocation7 + $0x744] ss:$16 sps:$4 sm:$0xff]   ;;  %v3811_v34 = vld [vmem:[#allocation7 + $0x2cc] ss:$16 sps:$4 sm:$0xff]  }
 0x203   :  { %v3779_v40 = vld [vmem:[#allocation7 + $0x760] ss:$16 sps:$4 sm:$0xff]   ;;  %v3790_v43 = vld [vmem:[#allocation7 + $0x524] ss:$16 sps:$4 sm:$0xff]  }
 0x204   :  { %2453 = vmatpush1.bf16.msra.mxu0 %v3722_v58  ;;  %v3782_v31 = vld [vmem:[#allocation7 + $0x540] ss:$16 sps:$4 sm:$0xff]   ;;  %v3793_v44 = vld [vmem:[#allocation7 + $0x724] ss:$16 sps:$4 sm:$0xff]   ;;  %v3802_v58 = vld [vmem:[#allocation7 + $0xec] ss:$16 sps:$4 sm:$0xff]  }
 0x205   :  { %2494 = vmatpush1.bf16.msra.mxu1 %v3725_v59  ;;  %2454 = vmatprep.subr.bf16.mxu0 %v3730_v60  ;;  %v3785_v42 = vld [vmem:[#allocation7 + $0x740] ss:$16 sps:$4 sm:$0xff]   ;;  %v3796_v51 = vld [vmem:[#allocation7 + $0x504] ss:$16 sps:$4 sm:$0xff]   ;;  %v795_v59 = vmax.f32 %v4344_v26, 0.0 }
 0x206   :  { %2495 = vmatprep.subr.bf16.mxu1 %v3733_v61  ;;  %v3788_v47 = vld [vmem:[#allocation7 + $0x520] ss:$16 sps:$4 sm:$0xff]   ;;  %v3799_v54 = vld [vmem:[#allocation7 + $0x704] ss:$16 sps:$4 sm:$0xff]   ;;  %v3805_v60 = vld [vmem:[#allocation7 + $0x2ec] ss:$16 sps:$4 sm:$0xff]  }
 0x207   :  { %v3791_v48 = vld [vmem:[#allocation7 + $0x720] ss:$16 sps:$4 sm:$0xff]   ;;  %v3800_v61 = vld [vmem:[#allocation7 + $0xe8] ss:$16 sps:$4 sm:$0xff]  }
 0x208   :  { %2455 = vmatpush1.bf16.msra.mxu0 %v3728_v62  ;;  %v3794_v55 = vld [vmem:[#allocation7 + $0x500] ss:$16 sps:$4 sm:$0xff]   ;;  %v4358_v62 = vpack.c.bf16 %v793_v56, %v793_v56  ;;  %v3806_v26 = vld [vmem:[#allocation7 + $0xc8] ss:$16 sps:$4 sm:$0xff]  }
 0x209   :  { %2496 = vmatpush1.bf16.msra.mxu1 %v3731_v63  ;;  %2456 = vmatprep.subr.bf16.mxu0 %v3736_v0  ;;  %v3797_v57 = vld [vmem:[#allocation7 + $0x700] ss:$16 sps:$4 sm:$0xff]   ;;  %v3803_v63 = vld [vmem:[#allocation7 + $0x2e8] ss:$16 sps:$4 sm:$0xff]   ;;  %v4360_v0 = vpack.c.bf16 %v795_v59, %v795_v59  ;;  %v3883_v59 = vld [vmem:[#allocation7 + $0x34c] ss:$16 sps:$4 sm:$0xff]  }
 0x20a   :  { %2497 = vmatprep.subr.bf16.mxu1 %v3739_v1  ;;  %v3808_v1 = vld [vmem:[#allocation7 + $0xcc] ss:$16 sps:$4 sm:$0xff]   ;;  %v3872_v56 = vld [vmem:[#allocation7 + $0x168] ss:$16 sps:$4 sm:$0xff]  }
 0x20c   :  { %2457 = vmatpush1.bf16.msra.mxu0 %v3734_v2  ;;  %v3809_v2 = vld [vmem:[#allocation7 + $0x2c8] ss:$16 sps:$4 sm:$0xff]  }
 0x20d   :  { %2498 = vmatpush1.bf16.msra.mxu1 %v3737_v3  ;;  %2458 = vmatprep.subr.bf16.mxu0 %v3742_v4  ;;  %v3814_v3 = vld [vmem:[#allocation7 + $0xac] ss:$16 sps:$4 sm:$0xff]  }
 0x20e   :  { %2499 = vmatprep.subr.bf16.mxu1 %v3745_v5  ;;  %v3817_v4 = vld [vmem:[#allocation7 + $0x2ac] ss:$16 sps:$4 sm:$0xff]   ;;  %v3812_v5 = vld [vmem:[#allocation7 + $0xa8] ss:$16 sps:$4 sm:$0xff]  }
 0x210   :  { %2459 = vmatpush1.bf16.msra.mxu0 %v3740_v6  ;;  %v3815_v6 = vld [vmem:[#allocation7 + $0x2a8] ss:$16 sps:$4 sm:$0xff]  }
 0x211   :  { %2500 = vmatpush1.bf16.msra.mxu1 %v3743_v7  ;;  %2460 = vmatprep.subr.bf16.mxu0 %v3748_v8  ;;  %v3820_v7 = vld [vmem:[#allocation7 + $0x8c] ss:$16 sps:$4 sm:$0xff]  }
 0x212   :  { %2501 = vmatprep.subr.bf16.mxu1 %v3751_v9  ;;  %v3823_v8 = vld [vmem:[#allocation7 + $0x28c] ss:$16 sps:$4 sm:$0xff]   ;;  %v3818_v9 = vld [vmem:[#allocation7 + $0x88] ss:$16 sps:$4 sm:$0xff]  }
 0x214   :  { %2461 = vmatpush1.bf16.msra.mxu0 %v3746_v10  ;;  %v3826_v10 = vld [vmem:[#allocation7 + $0x6c] ss:$16 sps:$4 sm:$0xff]  }
 0x215   :  { %2502 = vmatpush1.bf16.msra.mxu1 %v3749_v11  ;;  %2462 = vmatprep.subr.bf16.mxu0 %v3754_v12  ;;  %v3829_v11 = vld [vmem:[#allocation7 + $0x26c] ss:$16 sps:$4 sm:$0xff]   ;;  %v3827_v12 = vld [vmem:[#allocation7 + $0x268] ss:$16 sps:$4 sm:$0xff]  }
 0x216   :  { %2503 = vmatprep.subr.bf16.mxu1 %v3757_v13  ;;  %v3832_v13 = vld [vmem:[#allocation7 + $0x4c] ss:$16 sps:$4 sm:$0xff]  }
 0x218   :  { %2463 = vmatpush2.bf16.msra.mxu0 %v3752_v14  ;;  %v3835_v14 = vld [vmem:[#allocation7 + $0x24c] ss:$16 sps:$4 sm:$0xff]  }
 0x219   :  { %2504 = vmatpush2.bf16.msra.mxu1 %v3755_v15  ;;  %2464 = vmatprep.subr.bf16.mxu0 %v3760_v16  ;;  %v3830_v15 = vld [vmem:[#allocation7 + $0x48] ss:$16 sps:$4 sm:$0xff]  }
 0x21a   :  { %2505 = vmatprep.subr.bf16.mxu1 %v3763_v17  ;;  %v3833_v16 = vld [vmem:[#allocation7 + $0x248] ss:$16 sps:$4 sm:$0xff]   ;;  %v3838_v17 = vld [vmem:[#allocation7 + $0x2c] ss:$16 sps:$4 sm:$0xff]  }
 0x21c   :  { %2465 = vmatpush2.bf16.msra.mxu0 %v3758_v18  ;;  %v3841_v18 = vld [vmem:[#allocation7 + $0x22c] ss:$16 sps:$4 sm:$0xff]  }
 0x21d   :  { %2506 = vmatpush2.bf16.msra.mxu1 %v3761_v22  ;;  %2466 = vmatprep.subr.bf16.mxu0 %v3766_v23  ;;  %v3836_v22 = vld [vmem:[#allocation7 + $0x28] ss:$16 sps:$4 sm:$0xff]  }
 0x21e   :  { %2507 = vmatprep.subr.bf16.mxu1 %v3769_v24  ;;  %v3839_v23 = vld [vmem:[#allocation7 + $0x228] ss:$16 sps:$4 sm:$0xff]   ;;  %v3844_v24 = vld [vmem:[#allocation7 + $0xc] ss:$16 sps:$4 sm:$0xff]  }
 0x220   :  { %2467 = vmatpush2.bf16.msra.mxu0 %v3764_v29  ;;  %v3847_v29 = vld [vmem:[#allocation7 + $0x20c] ss:$16 sps:$4 sm:$0xff]  }
 0x221   :  { %2508 = vmatpush2.bf16.msra.mxu1 %v3767_v27  ;;  %2468 = vmatprep.subr.bf16.mxu0 %v3772_v32  ;;  %v3842_v27 = vld [vmem:[#allocation7 + $0x8] ss:$16 sps:$4 sm:$0xff]  }
 0x222   :  { %2509 = vmatprep.subr.bf16.mxu1 %v3775_v33  ;;  %v3845_v32 = vld [vmem:[#allocation7 + $0x208] ss:$16 sps:$4 sm:$0xff]   ;;  %v3850_v33 = vld [vmem:[#allocation7 + $0x1ec] ss:$16 sps:$4 sm:$0xff]  }
 0x224   :  { %2469 = vmatpush2.bf16.msra.mxu0 %v3770_v35  ;;  %v3853_v35 = vld [vmem:[#allocation7 + $0x3ec] ss:$16 sps:$4 sm:$0xff]  }
 0x225   :  { %2510 = vmatpush2.bf16.msra.mxu1 %v3773_v36  ;;  %2470 = vmatprep.subr.bf16.mxu0 %v3778_v37  ;;  %v3848_v36 = vld [vmem:[#allocation7 + $0x1e8] ss:$16 sps:$4 sm:$0xff]  }
 0x226   :  { %2511 = vmatprep.subr.bf16.mxu1 %v3781_v38  ;;  %v3851_v37 = vld [vmem:[#allocation7 + $0x3e8] ss:$16 sps:$4 sm:$0xff]   ;;  %v3856_v38 = vld [vmem:[#allocation7 + $0x1cc] ss:$16 sps:$4 sm:$0xff]  }
 0x228   :  { %2471 = vmatpush2.bf16.msra.mxu0 %v3776_v39  ;;  %v3859_v39 = vld [vmem:[#allocation7 + $0x3cc] ss:$16 sps:$4 sm:$0xff]  }
 0x229   :  { %2512 = vmatpush2.bf16.msra.mxu1 %v3779_v40  ;;  %2472 = vmatprep.subr.bf16.mxu0 %v3784_v41  ;;  %v3854_v40 = vld [vmem:[#allocation7 + $0x1c8] ss:$16 sps:$4 sm:$0xff]  }
 0x22a   :  { %2513 = vmatprep.subr.bf16.mxu1 %v3787_v30  ;;  %v3857_v41 = vld [vmem:[#allocation7 + $0x3c8] ss:$16 sps:$4 sm:$0xff]   ;;  %v3862_v30 = vld [vmem:[#allocation7 + $0x1ac] ss:$16 sps:$4 sm:$0xff]  }
 0x22c   :  { %2473 = vmatpush2.bf16.msra.mxu0 %v3782_v31  ;;  %v3865_v31 = vld [vmem:[#allocation7 + $0x3ac] ss:$16 sps:$4 sm:$0xff]  }
 0x22d   :  { %2514 = vmatpush2.bf16.msra.mxu1 %v3785_v42  ;;  %2474 = vmatprep.subr.bf16.mxu0 %v3790_v43  ;;  %v3860_v42 = vld [vmem:[#allocation7 + $0x1a8] ss:$16 sps:$4 sm:$0xff]  }
 0x22e   :  { %2515 = vmatprep.subr.bf16.mxu1 %v3793_v44  ;;  %v3863_v43 = vld [vmem:[#allocation7 + $0x3a8] ss:$16 sps:$4 sm:$0xff]   ;;  %v3868_v44 = vld [vmem:[#allocation7 + $0x18c] ss:$16 sps:$4 sm:$0xff]  }
 0x230   :  { %2475 = vmatpush2.bf16.msra.mxu0 %v3788_v47  ;;  %v3871_v47 = vld [vmem:[#allocation7 + $0x38c] ss:$16 sps:$4 sm:$0xff]  }
 0x231   :  { %2516 = vmatpush2.bf16.msra.mxu1 %v3791_v48  ;;  %2476 = vmatprep.subr.bf16.mxu0 %v3796_v51  ;;  %v3866_v48 = vld [vmem:[#allocation7 + $0x188] ss:$16 sps:$4 sm:$0xff]  }
 0x232   :  { %2517 = vmatprep.subr.bf16.mxu1 %v3799_v54  ;;  %v3869_v51 = vld [vmem:[#allocation7 + $0x388] ss:$16 sps:$4 sm:$0xff]   ;;  %v3874_v54 = vld [vmem:[#allocation7 + $0x16c] ss:$16 sps:$4 sm:$0xff]  }
 0x234   :  { %2477 = vmatpush2.bf16.msra.mxu0 %v3794_v55  ;;  %v3877_v55 = vld [vmem:[#allocation7 + $0x36c] ss:$16 sps:$4 sm:$0xff]  }
 0x235   :  { %2518 = vmatpush2.bf16.msra.mxu1 %v3797_v57  ;;  %2528 = vmatprep.subr.bf16.mxu0 %v3802_v58  ;;  %v3875_v57 = vld [vmem:[#allocation7 + $0x368] ss:$16 sps:$4 sm:$0xff]   ;;  %v3880_v58 = vld [vmem:[#allocation7 + $0x14c] ss:$16 sps:$4 sm:$0xff]  }
 0x236   :  { %2569 = vmatprep.subr.bf16.mxu1 %v3805_v60  ;;  %v3878_v60 = vld [vmem:[#allocation7 + $0x148] ss:$16 sps:$4 sm:$0xff]  }
 0x237   :  { %2479 = vmatmul.mubr.bf16.vlgmr.msra.gmra.mxu0 %v4358_v62 }
 0x238   :  { %2520 = vmatmul.mubr.bf16.vlgmr.msra.gmra.mxu1 %v4360_v0  ;;  %2529 = vmatpush1.bf16.msra.mxu0 %v3800_v61  ;;  %v3881_v61 = vld [vmem:[#allocation7 + $0x348] ss:$16 sps:$4 sm:$0xff]  }
 0x239   :  { %2560 = vmatprep.mubr.bf16.mxu0 %v4332_v19  ;;  %2570 = vmatpush1.bf16.msra.mxu1 %v3803_v63  ;;  %v3821_v19 = vld [vmem:[#allocation7 + $0x288] ss:$16 sps:$4 sm:$0xff]   ;;  %v3886_v63 = vld [vmem:[#allocation7 + $0x12c] ss:$16 sps:$4 sm:$0xff]  }
 0x23a   :  { %2601 = vmatprep.mubr.bf16.mxu1 %v4334_v20  ;;  %2530 = vmatprep.subr.bf16.mxu0 %v3808_v1  ;;  %v3824_v20 = vld [vmem:[#allocation7 + $0x68] ss:$16 sps:$4 sm:$0xff]   ;;  %v3889_v1 = vld [vmem:[#allocation7 + $0x32c] ss:$16 sps:$4 sm:$0xff]  }
 0x23b   :  { %2571 = vmatprep.subr.bf16.mxu1 %v3811_v34  ;;  %v3884_v34 = vld [vmem:[#allocation7 + $0x128] ss:$16 sps:$4 sm:$0xff]  }
 0x23c   :  { %2531 = vmatpush1.bf16.msra.mxu0 %v3806_v26  ;;  %v3887_v26 = vld [vmem:[#allocation7 + $0x328] ss:$16 sps:$4 sm:$0xff]  }
 0x23d   :  { %2572 = vmatpush1.bf16.msra.mxu1 %v3809_v2  ;;  %2532 = vmatprep.subr.bf16.mxu0 %v3814_v3  ;;  %v3892_v2 = vld [vmem:[#allocation7 + $0x10c] ss:$16 sps:$4 sm:$0xff]  }
 0x23e   :  { %2573 = vmatprep.subr.bf16.mxu1 %v3817_v4  ;;  %v3895_v3 = vld [vmem:[#allocation7 + $0x30c] ss:$16 sps:$4 sm:$0xff]   ;;  %v3890_v4 = vld [vmem:[#allocation7 + $0x108] ss:$16 sps:$4 sm:$0xff]  }
 0x240   :  { %2533 = vmatpush1.bf16.msra.mxu0 %v3812_v5  ;;  %v3893_v5 = vld [vmem:[#allocation7 + $0x308] ss:$16 sps:$4 sm:$0xff]  }
 0x241   :  { %2574 = vmatpush1.bf16.msra.mxu1 %v3815_v6  ;;  %2534 = vmatprep.subr.bf16.mxu0 %v3820_v7  ;;  %v3898_v6 = vld [vmem:[#allocation7 + $0x4ec] ss:$16 sps:$4 sm:$0xff]  }
 0x242   :  { %2575 = vmatprep.subr.bf16.mxu1 %v3823_v8  ;;  %v3901_v7 = vld [vmem:[#allocation7 + $0x6ec] ss:$16 sps:$4 sm:$0xff]   ;;  %v3896_v8 = vld [vmem:[#allocation7 + $0x4e8] ss:$16 sps:$4 sm:$0xff]  }
 0x244   :  { %2535 = vmatpush1.bf16.msra.mxu0 %v3818_v9  ;;  %v3899_v9 = vld [vmem:[#allocation7 + $0x6e8] ss:$16 sps:$4 sm:$0xff]  }
 0x245   :  { %2576 = vmatpush1.bf16.msra.mxu1 %v3821_v19  ;;  %2536 = vmatprep.subr.bf16.mxu0 %v3826_v10  ;;  %v3904_v19 = vld [vmem:[#allocation7 + $0x4cc] ss:$16 sps:$4 sm:$0xff]  }
 0x246   :  { %2577 = vmatprep.subr.bf16.mxu1 %v3829_v11  ;;  %v3907_v10 = vld [vmem:[#allocation7 + $0x6cc] ss:$16 sps:$4 sm:$0xff]   ;;  %v3902_v11 = vld [vmem:[#allocation7 + $0x4c8] ss:$16 sps:$4 sm:$0xff]  }
 0x248   :  { %2537 = vmatpush1.bf16.msra.mxu0 %v3824_v20  ;;  %v3905_v20 = vld [vmem:[#allocation7 + $0x6c8] ss:$16 sps:$4 sm:$0xff]  }
 0x249   :  { %2578 = vmatpush1.bf16.msra.mxu1 %v3827_v12  ;;  %2538 = vmatprep.subr.bf16.mxu0 %v3832_v13  ;;  %v3910_v12 = vld [vmem:[#allocation7 + $0x4ac] ss:$16 sps:$4 sm:$0xff]  }
 0x24a   :  { %2579 = vmatprep.subr.bf16.mxu1 %v3835_v14  ;;  %v3913_v13 = vld [vmem:[#allocation7 + $0x6ac] ss:$16 sps:$4 sm:$0xff]   ;;  %v3908_v14 = vld [vmem:[#allocation7 + $0x4a8] ss:$16 sps:$4 sm:$0xff]  }
 0x24c   :  { %2539 = vmatpush1.bf16.msra.mxu0 %v3830_v15  ;;  %v3916_v15 = vld [vmem:[#allocation7 + $0x48c] ss:$16 sps:$4 sm:$0xff]  }
 0x24d   :  { %2580 = vmatpush1.bf16.msra.mxu1 %v3833_v16  ;;  %2540 = vmatprep.subr.bf16.mxu0 %v3838_v17  ;;  %v3914_v16 = vld [vmem:[#allocation7 + $0x488] ss:$16 sps:$4 sm:$0xff]   ;;  %v3922_v17 = vld [vmem:[#allocation7 + $0x46c] ss:$16 sps:$4 sm:$0xff]  }
 0x24e   :  { %2581 = vmatprep.subr.bf16.mxu1 %v3841_v18  ;;  %v3925_v18 = vld [vmem:[#allocation7 + $0x66c] ss:$16 sps:$4 sm:$0xff]  }
 0x250   :  { %2541 = vmatpush1.bf16.msra.mxu0 %v3836_v22  ;;  %v3923_v22 = vld [vmem:[#allocation7 + $0x668] ss:$16 sps:$4 sm:$0xff]  }
 0x251   :  { %2582 = vmatpush1.bf16.msra.mxu1 %v3839_v23  ;;  %2542 = vmatprep.subr.bf16.mxu0 %v3844_v24  ;;  %v3928_v23 = vld [vmem:[#allocation7 + $0x44c] ss:$16 sps:$4 sm:$0xff]  }
 0x252   :  { %2583 = vmatprep.subr.bf16.mxu1 %v3847_v29  ;;  %v3931_v24 = vld [vmem:[#allocation7 + $0x64c] ss:$16 sps:$4 sm:$0xff]   ;;  %v3926_v29 = vld [vmem:[#allocation7 + $0x448] ss:$16 sps:$4 sm:$0xff]  }
 0x254   :  { %2543 = vmatpush1.bf16.msra.mxu0 %v3842_v27  ;;  %v3929_v27 = vld [vmem:[#allocation7 + $0x648] ss:$16 sps:$4 sm:$0xff]  }
 0x255   :  { %2584 = vmatpush1.bf16.msra.mxu1 %v3845_v32  ;;  %2544 = vmatprep.subr.bf16.mxu0 %v3850_v33  ;;  %v3934_v32 = vld [vmem:[#allocation7 + $0x42c] ss:$16 sps:$4 sm:$0xff]  }
 0x256   :  { %2585 = vmatprep.subr.bf16.mxu1 %v3853_v35  ;;  %v3937_v33 = vld [vmem:[#allocation7 + $0x62c] ss:$16 sps:$4 sm:$0xff]   ;;  %v3932_v35 = vld [vmem:[#allocation7 + $0x428] ss:$16 sps:$4 sm:$0xff]  }
 0x258   :  { %2545 = vmatpush2.bf16.msra.mxu0 %v3848_v36  ;;  %v3935_v36 = vld [vmem:[#allocation7 + $0x628] ss:$16 sps:$4 sm:$0xff]  }
 0x259   :  { %2586 = vmatpush2.bf16.msra.mxu1 %v3851_v37  ;;  %2546 = vmatprep.subr.bf16.mxu0 %v3856_v38  ;;  %v3940_v37 = vld [vmem:[#allocation7 + $0x40c] ss:$16 sps:$4 sm:$0xff]  }
 0x25a   :  { %2587 = vmatprep.subr.bf16.mxu1 %v3859_v39  ;;  %v3943_v38 = vld [vmem:[#allocation7 + $0x60c] ss:$16 sps:$4 sm:$0xff]   ;;  %v3938_v39 = vld [vmem:[#allocation7 + $0x408] ss:$16 sps:$4 sm:$0xff]  }
 0x25c   :  { %2547 = vmatpush2.bf16.msra.mxu0 %v3854_v40  ;;  %v3941_v40 = vld [vmem:[#allocation7 + $0x608] ss:$16 sps:$4 sm:$0xff]  }
 0x25d   :  { %2588 = vmatpush2.bf16.msra.mxu1 %v3857_v41  ;;  %2548 = vmatprep.subr.bf16.mxu0 %v3862_v30  ;;  %v3946_v41 = vld [vmem:[#allocation7 + $0x5ec] ss:$16 sps:$4 sm:$0xff]  }
 0x25e   :  { %2589 = vmatprep.subr.bf16.mxu1 %v3865_v31  ;;  %v3949_v30 = vld [vmem:[#allocation7 + $0x7ec] ss:$16 sps:$4 sm:$0xff]   ;;  %v3944_v31 = vld [vmem:[#allocation7 + $0x5e8] ss:$16 sps:$4 sm:$0xff]  }
 0x260   :  { %2549 = vmatpush2.bf16.msra.mxu0 %v3860_v42  ;;  %v3947_v42 = vld [vmem:[#allocation7 + $0x7e8] ss:$16 sps:$4 sm:$0xff]  }
 0x261   :  { %2590 = vmatpush2.bf16.msra.mxu1 %v3863_v43  ;;  %2550 = vmatprep.subr.bf16.mxu0 %v3868_v44  ;;  %v3952_v43 = vld [vmem:[#allocation7 + $0x5cc] ss:$16 sps:$4 sm:$0xff]  }
 0x262   :  { %2591 = vmatprep.subr.bf16.mxu1 %v3871_v47  ;;  %v3955_v44 = vld [vmem:[#allocation7 + $0x7cc] ss:$16 sps:$4 sm:$0xff]   ;;  %v3950_v47 = vld [vmem:[#allocation7 + $0x5c8] ss:$16 sps:$4 sm:$0xff]  }
 0x264   :  { %2551 = vmatpush2.bf16.msra.mxu0 %v3866_v48  ;;  %v3953_v48 = vld [vmem:[#allocation7 + $0x7c8] ss:$16 sps:$4 sm:$0xff]  }
 0x265   :  { %2592 = vmatpush2.bf16.msra.mxu1 %v3869_v51  ;;  %2552 = vmatprep.subr.bf16.mxu0 %v3874_v54  ;;  %v3958_v51 = vld [vmem:[#allocation7 + $0x5ac] ss:$16 sps:$4 sm:$0xff]  }
 0x266   :  { %2593 = vmatprep.subr.bf16.mxu1 %v3877_v55  ;;  %v3961_v54 = vld [vmem:[#allocation7 + $0x7ac] ss:$16 sps:$4 sm:$0xff]   ;;  %v3956_v55 = vld [vmem:[#allocation7 + $0x5a8] ss:$16 sps:$4 sm:$0xff]  }
 0x268   :  { %2553 = vmatpush2.bf16.msra.mxu0 %v3872_v56  ;;  %v3959_v56 = vld [vmem:[#allocation7 + $0x7a8] ss:$16 sps:$4 sm:$0xff]  }
 0x269   :  { %2594 = vmatpush2.bf16.msra.mxu1 %v3875_v57  ;;  %2554 = vmatprep.subr.bf16.mxu0 %v3880_v58  ;;  %v3964_v57 = vld [vmem:[#allocation7 + $0x58c] ss:$16 sps:$4 sm:$0xff]  }
 0x26a   :  { %2595 = vmatprep.subr.bf16.mxu1 %v3883_v59  ;;  %v3967_v58 = vld [vmem:[#allocation7 + $0x78c] ss:$16 sps:$4 sm:$0xff]   ;;  %v3962_v59 = vld [vmem:[#allocation7 + $0x588] ss:$16 sps:$4 sm:$0xff]  }
 0x26c   :  { %2555 = vmatpush2.bf16.msra.mxu0 %v3878_v60  ;;  %v3965_v60 = vld [vmem:[#allocation7 + $0x788] ss:$16 sps:$4 sm:$0xff]  }
 0x26d   :  { %2596 = vmatpush2.bf16.msra.mxu1 %v3881_v61  ;;  %2556 = vmatprep.subr.bf16.mxu0 %v3886_v63  ;;  %v3970_v61 = vld [vmem:[#allocation7 + $0x56c] ss:$16 sps:$4 sm:$0xff]  }
 0x26e   :  { %2597 = vmatprep.subr.bf16.mxu1 %v3889_v1  ;;  %v3973_v63 = vld [vmem:[#allocation7 + $0x76c] ss:$16 sps:$4 sm:$0xff]   ;;  %v3968_v1 = vld [vmem:[#allocation7 + $0x568] ss:$16 sps:$4 sm:$0xff]  }
 0x270   :  { %2557 = vmatpush2.bf16.msra.mxu0 %v3884_v34  ;;  %v3971_v34 = vld [vmem:[#allocation7 + $0x768] ss:$16 sps:$4 sm:$0xff]  }
 0x271   :  { %2598 = vmatpush2.bf16.msra.mxu1 %v3887_v26  ;;  %2558 = vmatprep.subr.bf16.mxu0 %v3892_v2  ;;  %v3976_v26 = vld [vmem:[#allocation7 + $0x54c] ss:$16 sps:$4 sm:$0xff]  }
 0x272   :  { %2599 = vmatprep.subr.bf16.mxu1 %v3895_v3  ;;  %v3979_v2 = vld [vmem:[#allocation7 + $0x74c] ss:$16 sps:$4 sm:$0xff]   ;;  %v3974_v3 = vld [vmem:[#allocation7 + $0x548] ss:$16 sps:$4 sm:$0xff]  }
 0x274   :  { %2559 = vmatpush2.bf16.msra.mxu0 %v3890_v4  ;;  %v3977_v4 = vld [vmem:[#allocation7 + $0x748] ss:$16 sps:$4 sm:$0xff]  }
 0x275   :  { %2600 = vmatpush2.bf16.msra.mxu1 %v3893_v5  ;;  %2610 = vmatprep.subr.bf16.mxu0 %v3898_v6  ;;  %v3982_v5 = vld [vmem:[#allocation7 + $0x52c] ss:$16 sps:$4 sm:$0xff]  }
 0x276   :  { %2651 = vmatprep.subr.bf16.mxu1 %v3901_v7  ;;  %v3985_v6 = vld [vmem:[#allocation7 + $0x72c] ss:$16 sps:$4 sm:$0xff]   ;;  %v3980_v7 = vld [vmem:[#allocation7 + $0x528] ss:$16 sps:$4 sm:$0xff]  }
 0x277   :  { %2561 = vmatmul.mubr.bf16.vlgmr.msra.gmra.mxu0 %v4336_v25  ;;  %v3911_v25 = vld [vmem:[#allocation7 + $0x6a8] ss:$16 sps:$4 sm:$0xff]  }
 0x278   :  { %2602 = vmatmul.mubr.bf16.vlgmr.msra.gmra.mxu1 %v4338_v28  ;;  %2611 = vmatpush1.bf16.msra.mxu0 %v3896_v8  ;;  %v3919_v28 = vld [vmem:[#allocation7 + $0x68c] ss:$16 sps:$4 sm:$0xff]   ;;  %v3983_v8 = vld [vmem:[#allocation7 + $0x728] ss:$16 sps:$4 sm:$0xff]  }
 0x279   :  { %2642 = vmatprep.mubr.bf16.mxu0 %v4350_v52  ;;  %2652 = vmatpush1.bf16.msra.mxu1 %v3899_v9  ;;  %v3917_v52 = vld [vmem:[#allocation7 + $0x688] ss:$16 sps:$4 sm:$0xff]   ;;  %v3988_v9 = vld [vmem:[#allocation7 + $0x50c] ss:$16 sps:$4 sm:$0xff]  }
 0x27a   :  { %2683 = vmatprep.mubr.bf16.mxu1 %v4352_v53  ;;  %2612 = vmatprep.subr.bf16.mxu0 %v3904_v19  ;;  %v3920_v53 = vld [vmem:[#allocation7 + $0x468] ss:$16 sps:$4 sm:$0xff]   ;;  %v3991_v19 = vld [vmem:[#allocation7 + $0x70c] ss:$16 sps:$4 sm:$0xff]  }
 0x27b   :  { %2653 = vmatprep.subr.bf16.mxu1 %v3907_v10  ;;  %v3986_v10 = vld [vmem:[#allocation7 + $0x508] ss:$16 sps:$4 sm:$0xff]  }
 0x27c   :  { %2613 = vmatpush1.bf16.msra.mxu0 %v3902_v11  ;;  %v3989_v11 = vld [vmem:[#allocation7 + $0x708] ss:$16 sps:$4 sm:$0xff]  }
 0x27d   :  { %2654 = vmatpush1.bf16.msra.mxu1 %v3905_v20  ;;  %2614 = vmatprep.subr.bf16.mxu0 %v3910_v12  ;;  %v3994_v20 = vld [vmem:[#allocation9 + $0x74] ss:$8 sps:$4 sm:$0xff]   ;;  %v3992_v12 = vld [vmem:[#allocation9 + $0x70] ss:$8 sps:$4 sm:$0xff]  }
 0x27e   :  { %2655 = vmatprep.subr.bf16.mxu1 %v3913_v13  ;;  %v3997_v13 = vld [vmem:[#allocation9 + $0x64] ss:$8 sps:$4 sm:$0xff]  }
 0x280   :  { %2615 = vmatpush1.bf16.msra.mxu0 %v3908_v14 }
 0x281   :  { %2656 = vmatpush1.bf16.msra.mxu1 %v3911_v25  ;;  %2616 = vmatprep.subr.bf16.mxu0 %v3916_v15  ;;  %v3995_v15 = vld [vmem:[#allocation9 + $0x60] ss:$8 sps:$4 sm:$0xff]  }
 0x282   :  { %2657 = vmatprep.subr.bf16.mxu1 %v3919_v28 }
 0x284   :  { %2617 = vmatpush1.bf16.msra.mxu0 %v3914_v16  ;;  %v4000_v16 = vld [vmem:[#allocation9 + $0x54] ss:$8 sps:$4 sm:$0xff]  }
 0x285   :  { %2658 = vmatpush1.bf16.msra.mxu1 %v3917_v52  ;;  %2618 = vmatprep.subr.bf16.mxu0 %v3922_v17 }
 0x286   :  { %2659 = vmatprep.subr.bf16.mxu1 %v3925_v18 }
 0x288   :  { %2619 = vmatpush1.bf16.msra.mxu0 %v3920_v53  ;;  %v3998_v53 = vld [vmem:[#allocation9 + $0x50] ss:$8 sps:$4 sm:$0xff]  }
 0x289   :  { %2660 = vmatpush1.bf16.msra.mxu1 %v3923_v22  ;;  %2620 = vmatprep.subr.bf16.mxu0 %v3928_v23 }
 0x28a   :  { %2661 = vmatprep.subr.bf16.mxu1 %v3931_v24  ;;  %v4040_v24 = vld [vmem:[#allocation9 + $0x170] ss:$8 sps:$4 sm:$0xff]  }
 0x28c   :  { %2621 = vmatpush1.bf16.msra.mxu0 %v3926_v29  ;;  %v4045_v29 = vld [vmem:[#allocation9 + $0x164] ss:$8 sps:$4 sm:$0xff]  }
 0x28d   :  { %2662 = vmatpush1.bf16.msra.mxu1 %v3929_v27  ;;  %2622 = vmatprep.subr.bf16.mxu0 %v3934_v32  ;;  %v4001_v27 = vld [vmem:[#allocation9 + $0x40] ss:$8 sps:$4 sm:$0xff]   ;;  %v4006_v32 = vld [vmem:[#allocation9 + $0x34] ss:$8 sps:$4 sm:$0xff]  }
 0x28e   :  { %2663 = vmatprep.subr.bf16.mxu1 %v3937_v33  ;;  %v4043_v33 = vld [vmem:[#allocation9 + $0x160] ss:$8 sps:$4 sm:$0xff]  }
 0x290   :  { %2623 = vmatpush1.bf16.msra.mxu0 %v3932_v35  ;;  %v4048_v35 = vld [vmem:[#allocation9 + $0x154] ss:$8 sps:$4 sm:$0xff]  }
 0x291   :  { %2664 = vmatpush1.bf16.msra.mxu1 %v3935_v36  ;;  %2624 = vmatprep.subr.bf16.mxu0 %v3940_v37  ;;  %v4004_v36 = vld [vmem:[#allocation9 + $0x30] ss:$8 sps:$4 sm:$0xff]   ;;  %v4009_v37 = vld [vmem:[#allocation9 + $0x24] ss:$8 sps:$4 sm:$0xff]  }
 0x292   :  { %2665 = vmatprep.subr.bf16.mxu1 %v3943_v38  ;;  %v4046_v38 = vld [vmem:[#allocation9 + $0x150] ss:$8 sps:$4 sm:$0xff]  }
 0x294   :  { %2625 = vmatpush1.bf16.msra.mxu0 %v3938_v39  ;;  %v4051_v39 = vld [vmem:[#allocation9 + $0x144] ss:$8 sps:$4 sm:$0xff]  }
 0x295   :  { %2666 = vmatpush1.bf16.msra.mxu1 %v3941_v40  ;;  %2626 = vmatprep.subr.bf16.mxu0 %v3946_v41  ;;  %v4007_v40 = vld [vmem:[#allocation9 + $0x20] ss:$8 sps:$4 sm:$0xff]   ;;  %v4012_v41 = vld [vmem:[#allocation9 + $0x14] ss:$8 sps:$4 sm:$0xff]  }
 0x296   :  { %2667 = vmatprep.subr.bf16.mxu1 %v3949_v30  ;;  %v4049_v30 = vld [vmem:[#allocation9 + $0x140] ss:$8 sps:$4 sm:$0xff]  }
 0x298   :  { %2627 = vmatpush2.bf16.msra.mxu0 %v3944_v31  ;;  %v4054_v31 = vld [vmem:[#allocation9 + $0x134] ss:$8 sps:$4 sm:$0xff]  }
 0x299   :  { %2668 = vmatpush2.bf16.msra.mxu1 %v3947_v42  ;;  %2628 = vmatprep.subr.bf16.mxu0 %v3952_v43  ;;  %v4010_v42 = vld [vmem:[#allocation9 + $0x10] ss:$8 sps:$4 sm:$0xff]   ;;  %v4015_v43 = vld [vmem:[#allocation9 + $0x4] ss:$8 sps:$4 sm:$0xff]  }
 0x29a   :  { %2669 = vmatprep.subr.bf16.mxu1 %v3955_v44  ;;  %v4052_v44 = vld [vmem:[#allocation9 + $0x130] ss:$8 sps:$4 sm:$0xff]  }
 0x29c   :  { %2629 = vmatpush2.bf16.msra.mxu0 %v3950_v47  ;;  %v4057_v47 = vld [vmem:[#allocation9 + $0x124] ss:$8 sps:$4 sm:$0xff]  }
 0x29d   :  { %2670 = vmatpush2.bf16.msra.mxu1 %v3953_v48  ;;  %2630 = vmatprep.subr.bf16.mxu0 %v3958_v51  ;;  %v4013_v48 = vld [vmem:[#allocation9] ss:$8 sps:$4 sm:$0xff]   ;;  %v4018_v51 = vld [vmem:[#allocation9 + $0xf4] ss:$8 sps:$4 sm:$0xff]  }
 0x29e   :  { %2671 = vmatprep.subr.bf16.mxu1 %v3961_v54  ;;  %v4055_v54 = vld [vmem:[#allocation9 + $0x120] ss:$8 sps:$4 sm:$0xff]  }
 0x2a0   :  { %2631 = vmatpush2.bf16.msra.mxu0 %v3956_v55  ;;  %v4060_v55 = vld [vmem:[#allocation9 + $0x114] ss:$8 sps:$4 sm:$0xff]  }
 0x2a1   :  { %2672 = vmatpush2.bf16.msra.mxu1 %v3959_v56  ;;  %2632 = vmatprep.subr.bf16.mxu0 %v3964_v57  ;;  %v4016_v56 = vld [vmem:[#allocation9 + $0xf0] ss:$8 sps:$4 sm:$0xff]   ;;  %v4021_v57 = vld [vmem:[#allocation9 + $0xe4] ss:$8 sps:$4 sm:$0xff]  }
 0x2a2   :  { %2673 = vmatprep.subr.bf16.mxu1 %v3967_v58  ;;  %v4058_v58 = vld [vmem:[#allocation9 + $0x110] ss:$8 sps:$4 sm:$0xff]  }
 0x2a4   :  { %2633 = vmatpush2.bf16.msra.mxu0 %v3962_v59  ;;  %v4063_v59 = vld [vmem:[#allocation9 + $0x104] ss:$8 sps:$4 sm:$0xff]  }
 0x2a5   :  { %2674 = vmatpush2.bf16.msra.mxu1 %v3965_v60  ;;  %2634 = vmatprep.subr.bf16.mxu0 %v3970_v61  ;;  %v4019_v60 = vld [vmem:[#allocation9 + $0xe0] ss:$8 sps:$4 sm:$0xff]   ;;  %v4024_v61 = vld [vmem:[#allocation9 + $0xd4] ss:$8 sps:$4 sm:$0xff]  }
 0x2a6   :  { %2675 = vmatprep.subr.bf16.mxu1 %v3973_v63  ;;  %v4061_v63 = vld [vmem:[#allocation9 + $0x100] ss:$8 sps:$4 sm:$0xff]  }
 0x2a8   :  { %2635 = vmatpush2.bf16.msra.mxu0 %v3968_v1  ;;  %v4066_v1 = vld [vmem:[#allocation9 + $0x1f4] ss:$8 sps:$4 sm:$0xff]  }
 0x2a9   :  { %2676 = vmatpush2.bf16.msra.mxu1 %v3971_v34  ;;  %2636 = vmatprep.subr.bf16.mxu0 %v3976_v26  ;;  %v4022_v34 = vld [vmem:[#allocation9 + $0xd0] ss:$8 sps:$4 sm:$0xff]   ;;  %v4027_v26 = vld [vmem:[#allocation9 + $0xc4] ss:$8 sps:$4 sm:$0xff]  }
 0x2aa   :  { %2677 = vmatprep.subr.bf16.mxu1 %v3979_v2  ;;  %v4064_v2 = vld [vmem:[#allocation9 + $0x1f0] ss:$8 sps:$4 sm:$0xff]  }
 0x2ac   :  { %2637 = vmatpush2.bf16.msra.mxu0 %v3974_v3  ;;  %v4069_v3 = vld [vmem:[#allocation9 + $0x1e4] ss:$8 sps:$4 sm:$0xff]  }
 0x2ad   :  { %2678 = vmatpush2.bf16.msra.mxu1 %v3977_v4  ;;  %2638 = vmatprep.subr.bf16.mxu0 %v3982_v5  ;;  %v4025_v4 = vld [vmem:[#allocation9 + $0xc0] ss:$8 sps:$4 sm:$0xff]   ;;  %v4030_v5 = vld [vmem:[#allocation9 + $0xb4] ss:$8 sps:$4 sm:$0xff]  }
 0x2ae   :  { %2679 = vmatprep.subr.bf16.mxu1 %v3985_v6  ;;  %v4067_v6 = vld [vmem:[#allocation9 + $0x1e0] ss:$8 sps:$4 sm:$0xff]  }
 0x2b0   :  { %2639 = vmatpush2.bf16.msra.mxu0 %v3980_v7  ;;  %v4072_v7 = vld [vmem:[#allocation9 + $0x1d4] ss:$8 sps:$4 sm:$0xff]  }
 0x2b1   :  { %2680 = vmatpush2.bf16.msra.mxu1 %v3983_v8  ;;  %2640 = vmatprep.subr.bf16.mxu0 %v3988_v9  ;;  %v4028_v8 = vld [vmem:[#allocation9 + $0xb0] ss:$8 sps:$4 sm:$0xff]   ;;  %v4033_v9 = vld [vmem:[#allocation9 + $0xa4] ss:$8 sps:$4 sm:$0xff]  }
 0x2b2   :  { %2681 = vmatprep.subr.bf16.mxu1 %v3991_v19  ;;  %v4070_v19 = vld [vmem:[#allocation9 + $0x1d0] ss:$8 sps:$4 sm:$0xff]  }
 0x2b4   :  { %2641 = vmatpush2.bf16.msra.mxu0 %v3986_v10  ;;  %v4075_v10 = vld [vmem:[#allocation9 + $0x1c4] ss:$8 sps:$4 sm:$0xff]  }
 0x2b5   :  { %2682 = vmatpush2.bf16.msra.mxu1 %v3989_v11  ;;  %3097 = vmatprep.subr.bf16.mxu0 %v3994_v20  ;;  %v4031_v11 = vld [vmem:[#allocation9 + $0xa0] ss:$8 sps:$4 sm:$0xff]   ;;  %v4036_v20 = vld [vmem:[#allocation9 + $0x94] ss:$8 sps:$4 sm:$0xff]  }
 0x2b7   :  { %2643 = vmatmul.mubr.bf16.vlgmr.msra.gmra.mxu0 %v4358_v62  ;;  %v4371_v14 = vpop.f32.mrf.mxu0  ;;  %v4003_v62 = vld [vmem:[#allocation9 + $0x44] ss:$8 sps:$4 sm:$0xff]  }
 0x2b8   :  { %2684 = vmatmul.mubr.bf16.vlgmr.msra.gmra.mxu1 %v4360_v0  ;;  %v4374_v25 = vpop.f32.mrf.mxu1  ;;  %3098 = vmatpush1.bf16.msra.mxu0 %v3992_v12  ;;  %v4042_v0 = vld [vmem:[#allocation9 + $0x174] ss:$8 sps:$4 sm:$0xff]   ;;  %v4073_v12 = vld [vmem:[#allocation9 + $0x1c0] ss:$8 sps:$4 sm:$0xff]  }
 0x2b9   :  { %v4376_v28 = vpop.f32.mrf.mxu0  ;;  %3099 = vmatprep.subr.bf16.mxu0 %v3997_v13  ;;  %3138 = vmatprep.subr.bf16.mxu1 %v4042_v0  ;;  %v4078_v13 = vld [vmem:[#allocation9 + $0x1b4] ss:$8 sps:$4 sm:$0xff]  }
 0x2ba   :  { %v4378_v52 = vpop.f32.mrf.mxu1  ;;  %3139 = vmatpush1.bf16.msra.mxu1 %v4040_v24 }
 0x2bb   :  { %v2402_v17 = vpop.f32.mrf.mxu0  ;;  %3140 = vmatprep.subr.bf16.mxu1 %v4045_v29 }
 0x2bc   :  { %v2443_v18 = vpop.f32.mrf.mxu1  ;;  %3100 = vmatpush1.bf16.msra.mxu0 %v3995_v15  ;;  %v798_v15 = vld [vmem:[#allocation10 + $0x2] ss:$8 sm:$0xf]  ;;  %v4039_v17 = vld [vmem:[#allocation9 + $0x84] ss:$8 sps:$4 sm:$0xff]  }
 0x2bd   :  { %v2403_v22 = vpop.f32.mrf.mxu0  ;;  %3101 = vmatprep.subr.bf16.mxu0 %v4000_v16  ;;  %v4034_v16 = vld [vmem:[#allocation9 + $0x90] ss:$8 sps:$4 sm:$0xff]  }
 0x2be   :  { %v2444_v23 = vpop.f32.mrf.mxu1  ;;  %3141 = vmatpush1.bf16.msra.mxu1 %v4043_v33  ;;  %v4076_v18 = vld [vmem:[#allocation9 + $0x1b0] ss:$8 sps:$4 sm:$0xff]   ;;  %v1071_v22 = vrot.slane %v798_v15, %v4321_v49 }
 0x2bf   :  { %3142 = vmatprep.subr.bf16.mxu1 %v4048_v35 }
 0x2c0   :  { %3102 = vmatpush1.bf16.msra.mxu0 %v3998_v53  ;;  %v1067_v53 = vrot.slane %v798_v15, %v4317_v45  ;;  %v2401_v24 = vadd.f32 %v4376_v28, %v1071_v22  ;;  %v2697_v22 = vld [vmem:[#allocation10 + $0x3] ss:$8 sm:$0x3] }
 0x2c1   :  { %3103 = vmatprep.subr.bf16.mxu0 %v4003_v62  ;;  %v4037_v62 = vld [vmem:[#allocation9 + $0x80] ss:$8 sps:$4 sm:$0xff]  }
 0x2c2   :  { %3143 = vmatpush1.bf16.msra.mxu1 %v4046_v38  ;;  %v2399_v23 = vadd.f32 %v4371_v14, %v1067_v53  ;;  %v4084_v14 = vld [vmem:[#allocation9 + $0x194] ss:$8 sps:$4 sm:$0xff]  }
 0x2c3   :  { %3144 = vmatprep.subr.bf16.mxu1 %v4051_v39 }
 0x2c4   :  { %3104 = vmatpush1.bf16.msra.mxu0 %v4001_v27  ;;  %v2440_v0 = vadd.f32 %v4374_v25, %v2399_v23  ;;  %v4081_v27 = vld [vmem:[#allocation9 + $0x1a4] ss:$8 sps:$4 sm:$0xff]   ;;  %v2774_v23 = vrot.slane %v2697_v22, %v4321_v49 }
 0x2c5   :  { %3105 = vmatprep.subr.bf16.mxu0 %v4006_v32  ;;  %v2442_v32 = vadd.f32 %v4378_v52, %v2401_v24  ;;  %v4087_v52 = vld [vmem:[#allocation9 + $0x184] ss:$8 sps:$4 sm:$0xff]  }
 0x2c6   :  { %3145 = vmatpush1.bf16.msra.mxu1 %v4049_v30 }
 0x2c7   :  { %3146 = vmatprep.subr.bf16.mxu1 %v4054_v31  ;;  %v4082_v31 = vld [vmem:[#allocation9 + $0x190] ss:$8 sps:$4 sm:$0xff]  }
 0x2c8   :  { %3106 = vmatpush1.bf16.msra.mxu0 %v4004_v36  ;;  %v4079_v36 = vld [vmem:[#allocation9 + $0x1a0] ss:$8 sps:$4 sm:$0xff]  }
 0x2c9   :  { %3107 = vmatprep.subr.bf16.mxu0 %v4009_v37 }
 0x2ca   :  { %3147 = vmatpush1.bf16.msra.mxu1 %v4052_v44 }
 0x2cb   :  { %3148 = vmatprep.subr.bf16.mxu1 %v4057_v47 }
 0x2cc   :  { %3108 = vmatpush1.bf16.msra.mxu0 %v4007_v40 }
 0x2cd   :  { %3109 = vmatprep.subr.bf16.mxu0 %v4012_v41 }
 0x2ce   :  { %3149 = vmatpush1.bf16.msra.mxu1 %v4055_v54 }
 0x2cf   :  { %3150 = vmatprep.subr.bf16.mxu1 %v4060_v55 }
 0x2d0   :  { %3110 = vmatpush1.bf16.msra.mxu0 %v4010_v42 }
 0x2d1   :  { %3111 = vmatprep.subr.bf16.mxu0 %v4015_v43 }
 0x2d2   :  { %3151 = vmatpush1.bf16.msra.mxu1 %v4058_v58 }
 0x2d3   :  { %3152 = vmatprep.subr.bf16.mxu1 %v4063_v59 }
 0x2d4   :  { %3112 = vmatpush1.bf16.msra.mxu0 %v4013_v48  ;;  %v4085_v48 = vld [vmem:[#allocation9 + $0x180] ss:$8 sps:$4 sm:$0xff]  }
 0x2d5   :  { %3113 = vmatprep.subr.bf16.mxu0 %v4018_v51 }
 0x2d6   :  { %3153 = vmatpush1.bf16.msra.mxu1 %v4061_v63  ;;  %v1075_v63 = vrot.slane %v798_v15, %v751_v46 }
 0x2d7   :  { %3154 = vmatprep.subr.bf16.mxu1 %v4066_v1  ;;  %v1079_v1 = vrot.slane %v798_v15, %v755_v50 }
 0x2d8   :  { %3114 = vmatpush2.bf16.msra.mxu0 %v4016_v56 }
 0x2d9   :  { %3115 = vmatprep.subr.bf16.mxu0 %v4021_v57 }
 0x2da   :  { %3155 = vmatpush2.bf16.msra.mxu1 %v4064_v2 }
 0x2db   :  { %3156 = vmatprep.subr.bf16.mxu1 %v4069_v3 }
 0x2dc   :  { %3116 = vmatpush2.bf16.msra.mxu0 %v4019_v60 }
 0x2dd   :  { %3117 = vmatprep.subr.bf16.mxu0 %v4024_v61 }
 0x2de   :  { %3157 = vmatpush2.bf16.msra.mxu1 %v4067_v6 }
 0x2df   :  { %3158 = vmatprep.subr.bf16.mxu1 %v4072_v7 }
 0x2e0   :  { %3118 = vmatpush2.bf16.msra.mxu0 %v4022_v34 }
 0x2e1   :  { %3119 = vmatprep.subr.bf16.mxu0 %v4027_v26 }
 0x2e2   :  { %3159 = vmatpush2.bf16.msra.mxu1 %v4070_v19 }
 0x2e3   :  { %3160 = vmatprep.subr.bf16.mxu1 %v4075_v10 }
 0x2e4   :  { %3120 = vmatpush2.bf16.msra.mxu0 %v4025_v4 }
 0x2e5   :  { %3121 = vmatprep.subr.bf16.mxu0 %v4030_v5 }
 0x2e6   :  { %3161 = vmatpush2.bf16.msra.mxu1 %v4073_v12 }
 0x2e7   :  { %3162 = vmatprep.subr.bf16.mxu1 %v4078_v13 }
 0x2e8   :  { %3122 = vmatpush2.bf16.msra.mxu0 %v4028_v8 }
 0x2e9   :  { %3123 = vmatprep.subr.bf16.mxu0 %v4033_v9 }
 0x2ea   :  { %3163 = vmatpush2.bf16.msra.mxu1 %v4076_v18 }
 0x2eb   :  { %3164 = vmatprep.subr.bf16.mxu1 %v4081_v27 }
 0x2ec   :  { %3124 = vmatpush2.bf16.msra.mxu0 %v4031_v11 }
 0x2ed   :  { %3125 = vmatprep.subr.bf16.mxu0 %v4036_v20 }
 0x2ee   :  { %3165 = vmatpush2.bf16.msra.mxu1 %v4079_v36 }
 0x2ef   :  { %3166 = vmatprep.subr.bf16.mxu1 %v4084_v14 }
 0x2f0   :  { %3126 = vmatpush2.bf16.msra.mxu0 %v4034_v16 }
 0x2f1   :  { %3127 = vmatprep.subr.bf16.mxu0 %v4039_v17 }
 0x2f2   :  { %3167 = vmatpush2.bf16.msra.mxu1 %v4082_v31  ;;  %v3183_v31 = vld [vmem:[#allocation10 + $0x4] ss:$0 sm:$0xff] }
 0x2f3   :  { %3168 = vmatprep.subr.bf16.mxu1 %v4087_v52 }
 0x2f4   :  { %3128 = vmatpush2.bf16.msra.mxu0 %v4037_v62  ;;  %v2770_v62 = vrot.slane %v2697_v22, %v4317_v45 }
 0x2f6   :  { %3169 = vmatpush2.bf16.msra.mxu1 %v4085_v48 }
 0x2f7   :  { %v2480_v29 = vpop.f32.mrf.mxu0 }
 0x2f8   :  { %v2481_v33 = vadd.f32 %v2480_v29, %v2440_v0  ;;  %v2521_v35 = vpop.f32.mrf.mxu1  ;;  %v3182_v29 = vld [vmem:[#allocation10 + $0x5] ss:$8 sm:$0x3] }
 0x2f9   :  { %v2482_v37 = vpop.f32.mrf.mxu0 }
 0x2fa   :  { %v2522_v38 = vadd.f32 %v2521_v35, %v2481_v33  ;;  %v2483_v39 = vadd.f32 %v2482_v37, %v2442_v32  ;;  %v2523_v40 = vpop.f32.mrf.mxu1  ;;  %v3188_v37 = vrot.slane %v3182_v29, %v4317_v45 }
 0x2fb   :  { %v2484_v41 = vpop.f32.mrf.mxu0 }
 0x2fc   :  { %v2524_v30 = vadd.f32 %v2523_v40, %v2483_v39  ;;  %v2525_v28 = vpop.f32.mrf.mxu1  ;;  %v2692_v42 = vmax.f32 %v2522_v38, 0.0  ;;  %v3192_v38 = vrot.slane %v3182_v29, %v4321_v49 }
 0x2fd   :  { %v2485_v25 = vpop.f32.mrf.mxu0 }
 0x2fe   :  { %v2693_v43 = vmax.f32 %v2524_v30, 0.0  ;;  %v2526_v44 = vpop.f32.mrf.mxu1  ;;  %v2698_v51 = vpack.c.bf16 %v2692_v42, %v2692_v42 }
 0x300   :  { %v2699_v47 = vpack.c.bf16 %v2693_v43, %v2693_v43 }
 0x302   :  { %3129 = vmatprep.mubr.bf16.mxu0 %v2699_v47 }
 0x303   :  { %3130 = vmatmul.mubr.bf16.vlgmr.msra.gmra.mxu0 %v2698_v51 }
 0x337   :  { %v2562_v54 = vpop.f32.mrf.mxu0 }
 0x338   :  { %v2603_v55 = vpop.f32.mrf.mxu1  ;;  %v2563_v34 = vadd.f32 %v2562_v54, %v1075_v63 }
 0x339   :  { %v2564_v56 = vpop.f32.mrf.mxu0 }
 0x33a   :  { %v2605_v57 = vpop.f32.mrf.mxu1  ;;  %v2565_v26 = vadd.f32 %v2564_v56, %v1079_v1  ;;  %v2604_v2 = vadd.f32 %v2603_v55, %v2563_v34 }
 0x33b   :  { %v2566_v58 = vpop.f32.mrf.mxu0 }
 0x33c   :  { %v2607_v59 = vpop.f32.mrf.mxu1  ;;  %v2606_v4 = vadd.f32 %v2605_v57, %v2565_v26 }
 0x33d   :  { %v2567_v60 = vpop.f32.mrf.mxu0 }
 0x33e   :  { %v2608_v61 = vpop.f32.mrf.mxu1 }
 0x377   :  { %v2644_v3 = vpop.f32.mrf.mxu0 }
 0x378   :  { %v2645_v5 = vadd.f32 %v2644_v3, %v2604_v2  ;;  %v2685_v6 = vpop.f32.mrf.mxu1 }
 0x379   :  { %v2646_v7 = vpop.f32.mrf.mxu0 }
 0x37a   :  { %v2686_v8 = vadd.f32 %v2685_v6, %v2645_v5  ;;  %v2647_v9 = vadd.f32 %v2646_v7, %v2606_v4  ;;  %v2687_v19 = vpop.f32.mrf.mxu1 }
 0x37b   :  { %v2648_v10 = vpop.f32.mrf.mxu0 }
 0x37c   :  { %v2688_v11 = vadd.f32 %v2687_v19, %v2647_v9  ;;  %v2689_v20 = vpop.f32.mrf.mxu1  ;;  %v2694_v12 = vmax.f32 %v2686_v8, 0.0 }
 0x37d   :  { %v2649_v13 = vpop.f32.mrf.mxu0 }
 0x37e   :  { %v2695_v46 = vmax.f32 %v2688_v11, 0.0  ;;  %v2690_v16 = vpop.f32.mrf.mxu1  ;;  %v2700_v50 = vpack.c.bf16 %v2694_v12, %v2694_v12 }
 0x380   :  { %v2701_v21 = vpack.c.bf16 %v2695_v46, %v2695_v46 }
 0x382   :  { %3170 = vmatprep.mubr.bf16.mxu1 %v2701_v21 }
 0x383   :  { %3171 = vmatmul.mubr.bf16.vlgmr.msra.gmra.mxu1 %v2700_v50 }
 0x3c3   :  { %v3131_v15 = vpop.f32.mrf.mxu0 }
 0x3c4   :  { %v3132_v24 = vadd.f32 %v3131_v15, %v2770_v62 }
 0x3c5   :  { %v3133_v17 = vpop.f32.mrf.mxu0 }
 0x3c6   :  { %v3134_v27 = vadd.f32 %v3133_v17, %v2774_v23 }
 0x3c7   :  { %v3135_v18 = vpop.f32.mrf.mxu0 }
 0x3c9   :  { %v3136_v53 = vpop.f32.mrf.mxu0 }
 0x443   :  { %v3172_v0 = vpop.f32.mrf.mxu1 }
 0x444   :  { %v3173_v32 = vadd.f32 %v3172_v0, %v3132_v24 }
 0x445   :  { %v3174_v33 = vpop.f32.mrf.mxu1 }
 0x446   :  { %v3179_v35 = vmax.f32 %v3173_v32, 0.0  ;;  %v3175_v36 = vadd.f32 %v3174_v33, %v3134_v27 }
 0x447   :  { %v3176_v39 = vpop.f32.mrf.mxu1 }
 0x448   :  { %v3180_v40 = vmax.f32 %v3175_v36, 0.0  ;;  %v3195_v14 = vmul.f32 %v3188_v37, %v3179_v35 }
 0x449   :  { %v3177_v41 = vpop.f32.mrf.mxu1 }
 0x44a   :  { %v3196_v30 = vmul.f32 %v3192_v38, %v3180_v40 }
 0x44c   :  { %v3197_v28 = vadd.f32 %v3196_v30, %v3195_v14 }
 0x44e   :  { %3198 = vadd.xlane.f32.xlu0 %v3197_v28 }
 0x4d7   :  { %v3199_v42 = vpop.xlane.xlu0 %3198 }
 0x4d8   :  { %v3200_v25 = vadd.f32 %v3199_v42, %v3183_v31 }
 0x4da   :  { %3202 = vst.msk [vmem:[%s4403_s6] sm:$0xff] %vm3201_vm3, %v3200_v25 }
 0x4db   :  { %3207 = vsyncpa [#allocation3], 1 }
 0x4dc   :  { %3208 = vsyncpa [#allocation5], 1 }
 0x4dd   :  { %3209 = vsyncpa [#allocation8], 1 }
 0x4de   :  { %3210 = vsyncpa [#allocation11], 1 }

</bundles_post_ra>
